<compile_context>
chip_gen: v6e
topology: v6e:2x2x1
jax: 0.10.0
libtpu: 0.0.40
codegen_flags: <defaults>
</compile_context>

<pallas_src>
import jax
import jax.numpy as jnp
from jax.experimental import pallas as pl
from jax.experimental.pallas import tpu as pltpu


def _conv3x3_row_gemm_kernel(p_ref, w_ref, b_ref, o_ref):
    """3x3 same-conv on a tile of TH output rows, one GEMM per row.

    p_ref: (1, TH, 3*Cin, W+2)  kh-stacked, spatially padded input rows
    w_ref: (Cout, 9*Cin)        weights, K flattened as (kw, kh, ci)
    b_ref: (Cout, 1)            bias
    o_ref: (1, TH, Cout, W)     output rows
    """
    th = o_ref.shape[1]
    w_out = o_ref.shape[3]
    wmat = w_ref[...]                      # (Cout, 9*Cin)
    bias = b_ref[...]                      # (Cout, 1)
    for h in range(th):                    # short static loop, unrolled
        row = p_ref[0, h]                  # (3*Cin, W+2)
        # Fold the 3 horizontal taps into K via static lane slices: (9*Cin, W).
        cols = jnp.concatenate([row[:, kw:kw + w_out] for kw in range(3)], axis=0)
        acc = jnp.dot(wmat, cols, preferred_element_type=jnp.float32) + bias
        o_ref[0, h] = acc.astype(o_ref.dtype)


def _pick_row_tile(H, Wp, K3, Cout, W, budget_bytes=8 * 1024 * 1024):
    """Largest sublane-aligned row tile whose double-buffered blocks fit the budget."""
    per_row = 4 * (K3 * Wp + Cout * W)     # f32 bytes of (input + output) per output row
    candidates = [th for th in (8, 16, 32, 64, 128) if H % th == 0]
    if not candidates:
        return H
    fitting = [th for th in candidates if 2 * th * per_row <= budget_bytes]
    return max(fitting) if fitting else min(candidates)


def conv3x3_same(x_nchw, weight_oihw, bias):
    """nn.Conv2d(Cin, Cout, 3, stride=1, padding=1, bias=True) via Pallas."""
    B, Cin, H, W = x_nchw.shape
    Cout = weight_oihw.shape[0]
    Wp = W + 2

    # Spatial zero-pad + fold the 3 vertical taps into the channel axis:
    # p3[b, h, kh*Cin + ci, wp] = x_pad[b, ci, h + kh, wp]     shape (B, H, 3*Cin, W+2)
    x_pad = jnp.pad(x_nchw, ((0, 0), (0, 0), (1, 1), (1, 1)))
    slabs = jnp.stack([x_pad[:, :, kh:kh + H, :] for kh in range(3)], axis=1)
    p3 = slabs.transpose(0, 3, 1, 2, 4).reshape(B, H, 3 * Cin, Wp)

    # Weight flattened to (Cout, 9*Cin) with K ordered (kw, kh, ci) to match `cols`.
    w2d = jnp.transpose(weight_oihw, (0, 3, 2, 1)).reshape(Cout, 9 * Cin)
    b2d = bias.reshape(Cout, 1)

    TH = _pick_row_tile(H, Wp, 3 * Cin, Cout, W)
    grid = (B, H // TH)

    out_bhcw = pl.pallas_call(
        _conv3x3_row_gemm_kernel,
        out_shape=jax.ShapeDtypeStruct((B, H, Cout, W), x_nchw.dtype),
        grid_spec=pltpu.PrefetchScalarGridSpec(
            num_scalar_prefetch=0,
            grid=grid,
            in_specs=[
                pl.BlockSpec((1, TH, 3 * Cin, Wp), lambda b, t: (b, t, 0, 0)),
                pl.BlockSpec((Cout, 9 * Cin), lambda b, t: (0, 0)),
                pl.BlockSpec((Cout, 1), lambda b, t: (0, 0)),
            ],
            out_specs=pl.BlockSpec((1, TH, Cout, W), lambda b, t: (b, t, 0, 0)),
        ),
        compiler_params=pltpu.CompilerParams(
            dimension_semantics=("parallel", "parallel"),
            vmem_limit_bytes=32 * 1024 * 1024,
        ),
    )(p3, w2d, b2d)

    # (B, H, Cout, W) -> (B, Cout, H, W) to match the PyTorch NCHW output.
    return out_bhcw.transpose(0, 2, 1, 3)


def pixel_unshuffle2(x_nchw):
    """torch.nn.PixelUnshuffle(2): out[b, c*4 + 2*i + j, h, w] = in[b, c, 2h+i, 2w+j]."""
    B, C, H, W = x_nchw.shape
    x = x_nchw.reshape(B, C, H // 2, 2, W // 2, 2)
    x = x.transpose(0, 1, 3, 5, 2, 4)
    return x.reshape(B, C * 4, H // 2, W // 2)


def downsample(x, w1, b1, w2, b2):
    """Forward of the Downsample module."""
    y = conv3x3_same(x, w1, b1)
    y = pixel_unshuffle2(y)
    y = conv3x3_same(y, w2, b2)
    return y


if __name__ == "__main__":
    key = jax.random.PRNGKey(0)
    k1, k2, k3, k4, kx = jax.random.split(key, 5)

    B, dim, H, W = 2, 4, 16, 16
    x = jax.random.normal(kx, (B, dim, H, W), dtype=jnp.float32)
    w1 = 0.1 * jax.random.normal(k1, (dim, dim, 3, 3), dtype=jnp.float32)
    b1 = 0.1 * jax.random.normal(k2, (dim,), dtype=jnp.float32)
    w2 = 0.1 * jax.random.normal(k3, (4 * dim, 4 * dim, 3, 3), dtype=jnp.float32)
    b2 = 0.1 * jax.random.normal(k4, (4 * dim,), dtype=jnp.float32)

    out = jax.jit(downsample)(x, w1, b1, w2, b2)
    out = jax.block_until_ready(out)
    assert out.shape == (B, 4 * dim, H // 2, W // 2)

    # Reference: XLA convolutions (same semantics as the PyTorch module).
    def ref_conv(z, w, b):
        y = jax.lax.conv_general_dilated(
            z, w, window_strides=(1, 1), padding=((1, 1), (1, 1)),
            dimension_numbers=("NCHW", "OIHW", "NCHW"))
        return y + b.reshape(1, -1, 1, 1)

    ref = ref_conv(pixel_unshuffle2(ref_conv(x, w1, b1)), w2, b2)
    max_diff = float(jnp.max(jnp.abs(out - ref)))
    assert jnp.allclose(out, ref, atol=1e-4, rtol=1e-3), max_diff

    print("KERNEL_OK")
</pallas_src>

<mosaic_0001>
module attributes {stable_mosaic.version = 11 : i64} {
  func.func @_conv3x3_row_gemm_kernel(%arg0: i32, %arg1: i32, %arg2: memref<1x16x12x18xf32, #tpu.memory_space<vmem>>, %arg3: memref<4x36xf32, #tpu.memory_space<vmem>>, %arg4: memref<4x1xf32, #tpu.memory_space<vmem>>, %arg5: memref<1x16x4x16xf32, #tpu.memory_space<vmem>>) attributes {dimension_semantics = [#tpu.dimension_semantics<parallel>, #tpu.dimension_semantics<parallel>], iteration_bounds = array<i64: 2, 1>, scalar_prefetch = 0 : i64, scratch_operands = 0 : i64, tpu.core_type = #tpu.core_type<tc>, window_params = [{transform_indices = @transform_0, window_bounds = array<i64: 1, 16, 12, 18>}, {pipeline_mode = #tpu.pipeline_mode<synchronous>, transform_indices = @transform_1, window_bounds = array<i64: 4, 36>}, {pipeline_mode = #tpu.pipeline_mode<synchronous>, transform_indices = @transform_2, window_bounds = array<i64: 4, 1>}, {transform_indices = @transform_3, window_bounds = array<i64: 1, 16, 4, 16>}]} {
    %c0 = arith.constant 0 : index
    %c0_0 = arith.constant 0 : index
    %0 = vector.load %arg3[%c0, %c0_0] : memref<4x36xf32, #tpu.memory_space<vmem>>, vector<4x36xf32>
    %c0_1 = arith.constant 0 : index
    %c0_2 = arith.constant 0 : index
    %1 = vector.load %arg4[%c0_1, %c0_2] : memref<4x1xf32, #tpu.memory_space<vmem>>, vector<4x1xf32>
    %c0_3 = arith.constant 0 : index
    %c0_4 = arith.constant 0 : index
    %c0_5 = arith.constant 0 : index
    %c0_6 = arith.constant 0 : index
    %2 = vector.load %arg2[%c0_3, %c0_4, %c0_5, %c0_6] : memref<1x16x12x18xf32, #tpu.memory_space<vmem>>, vector<1x1x12x18xf32>
    %3 = vector.shape_cast %2 : vector<1x1x12x18xf32> to vector<12x18xf32>
    %4 = vector.extract_strided_slice %3 {offsets = [0, 0], sizes = [12, 16], strides = [1, 1]} : vector<12x18xf32> to vector<12x16xf32>
    %5 = vector.extract_strided_slice %3 {offsets = [0, 1], sizes = [12, 16], strides = [1, 1]} : vector<12x18xf32> to vector<12x16xf32>
    %6 = vector.extract_strided_slice %3 {offsets = [0, 2], sizes = [12, 16], strides = [1, 1]} : vector<12x18xf32> to vector<12x16xf32>
    %7 = tpu.concatenate %4, %5, %6 in 0 : vector<12x16xf32>, vector<12x16xf32>, vector<12x16xf32> -> vector<36x16xf32>
    %cst = arith.constant dense<0.000000e+00> : vector<4x16xf32>
    %8 = tpu.matmul %0, %7, %cst {dimension_numbers = #tpu.dot_dimension_numbers<[1], [0], [0], [1], [0, 0, 1, 1], [], []>} : vector<4x36xf32>, vector<36x16xf32>, vector<4x16xf32> -> vector<4x16xf32>
    %9 = vector.broadcast %1 : vector<4x1xf32> to vector<4x16xf32>
    %10 = arith.addf %8, %9 : vector<4x16xf32>
    %c0_7 = arith.constant 0 : index
    %c0_8 = arith.constant 0 : index
    %c0_9 = arith.constant 0 : index
    %c0_10 = arith.constant 0 : index
    %11 = vector.load %arg5[%c0_7, %c0_8, %c0_9, %c0_10] : memref<1x16x4x16xf32, #tpu.memory_space<vmem>>, vector<1x1x4x16xf32>
    %12 = vector.shape_cast %11 : vector<1x1x4x16xf32> to vector<4x16xf32>
    %13 = vector.shape_cast %10 : vector<4x16xf32> to vector<1x1x4x16xf32>
    tpu.vector_store %arg5[%c0_7, %c0_8, %c0_9, %c0_10], %13 {strides = array<i32>} : memref<1x16x4x16xf32, #tpu.memory_space<vmem>>, vector<1x1x4x16xf32>,
    %c0_11 = arith.constant 0 : index
    %c1 = arith.constant 1 : index
    %c0_12 = arith.constant 0 : index
    %c0_13 = arith.constant 0 : index
    %14 = vector.load %arg2[%c0_11, %c1, %c0_12, %c0_13] : memref<1x16x12x18xf32, #tpu.memory_space<vmem>>, vector<1x1x12x18xf32>
    %15 = vector.shape_cast %14 : vector<1x1x12x18xf32> to vector<12x18xf32>
    %16 = vector.extract_strided_slice %15 {offsets = [0, 0], sizes = [12, 16], strides = [1, 1]} : vector<12x18xf32> to vector<12x16xf32>
    %17 = vector.extract_strided_slice %15 {offsets = [0, 1], sizes = [12, 16], strides = [1, 1]} : vector<12x18xf32> to vector<12x16xf32>
    %18 = vector.extract_strided_slice %15 {offsets = [0, 2], sizes = [12, 16], strides = [1, 1]} : vector<12x18xf32> to vector<12x16xf32>
    %19 = tpu.concatenate %16, %17, %18 in 0 : vector<12x16xf32>, vector<12x16xf32>, vector<12x16xf32> -> vector<36x16xf32>
    %cst_14 = arith.constant dense<0.000000e+00> : vector<4x16xf32>
    %20 = tpu.matmul %0, %19, %cst_14 {dimension_numbers = #tpu.dot_dimension_numbers<[1], [0], [0], [1], [0, 0, 1, 1], [], []>} : vector<4x36xf32>, vector<36x16xf32>, vector<4x16xf32> -> vector<4x16xf32>
    %21 = vector.broadcast %1 : vector<4x1xf32> to vector<4x16xf32>
    %22 = arith.addf %20, %21 : vector<4x16xf32>
    %c0_15 = arith.constant 0 : index
    %c1_16 = arith.constant 1 : index
    %c0_17 = arith.constant 0 : index
    %c0_18 = arith.constant 0 : index
    %23 = vector.load %arg5[%c0_15, %c1_16, %c0_17, %c0_18] : memref<1x16x4x16xf32, #tpu.memory_space<vmem>>, vector<1x1x4x16xf32>
    %24 = vector.shape_cast %23 : vector<1x1x4x16xf32> to vector<4x16xf32>
    %25 = vector.shape_cast %22 : vector<4x16xf32> to vector<1x1x4x16xf32>
    tpu.vector_store %arg5[%c0_15, %c1_16, %c0_17, %c0_18], %25 {strides = array<i32>} : memref<1x16x4x16xf32, #tpu.memory_space<vmem>>, vector<1x1x4x16xf32>,
    %c0_19 = arith.constant 0 : index
    %c2 = arith.constant 2 : index
    %c0_20 = arith.constant 0 : index
    %c0_21 = arith.constant 0 : index
    %26 = vector.load %arg2[%c0_19, %c2, %c0_20, %c0_21] : memref<1x16x12x18xf32, #tpu.memory_space<vmem>>, vector<1x1x12x18xf32>
    %27 = vector.shape_cast %26 : vector<1x1x12x18xf32> to vector<12x18xf32>
    %28 = vector.extract_strided_slice %27 {offsets = [0, 0], sizes = [12, 16], strides = [1, 1]} : vector<12x18xf32> to vector<12x16xf32>
    %29 = vector.extract_strided_slice %27 {offsets = [0, 1], sizes = [12, 16], strides = [1, 1]} : vector<12x18xf32> to vector<12x16xf32>
    %30 = vector.extract_strided_slice %27 {offsets = [0, 2], sizes = [12, 16], strides = [1, 1]} : vector<12x18xf32> to vector<12x16xf32>
    %31 = tpu.concatenate %28, %29, %30 in 0 : vector<12x16xf32>, vector<12x16xf32>, vector<12x16xf32> -> vector<36x16xf32>
    %cst_22 = arith.constant dense<0.000000e+00> : vector<4x16xf32>
    %32 = tpu.matmul %0, %31, %cst_22 {dimension_numbers = #tpu.dot_dimension_numbers<[1], [0], [0], [1], [0, 0, 1, 1], [], []>} : vector<4x36xf32>, vector<36x16xf32>, vector<4x16xf32> -> vector<4x16xf32>
    %33 = vector.broadcast %1 : vector<4x1xf32> to vector<4x16xf32>
    %34 = arith.addf %32, %33 : vector<4x16xf32>
    %c0_23 = arith.constant 0 : index
    %c2_24 = arith.constant 2 : index
    %c0_25 = arith.constant 0 : index
    %c0_26 = arith.constant 0 : index
    %35 = vector.load %arg5[%c0_23, %c2_24, %c0_25, %c0_26] : memref<1x16x4x16xf32, #tpu.memory_space<vmem>>, vector<1x1x4x16xf32>
    %36 = vector.shape_cast %35 : vector<1x1x4x16xf32> to vector<4x16xf32>
    %37 = vector.shape_cast %34 : vector<4x16xf32> to vector<1x1x4x16xf32>
    tpu.vector_store %arg5[%c0_23, %c2_24, %c0_25, %c0_26], %37 {strides = array<i32>} : memref<1x16x4x16xf32, #tpu.memory_space<vmem>>, vector<1x1x4x16xf32>,
    %c0_27 = arith.constant 0 : index
    %c3 = arith.constant 3 : index
    %c0_28 = arith.constant 0 : index
    %c0_29 = arith.constant 0 : index
    %38 = vector.load %arg2[%c0_27, %c3, %c0_28, %c0_29] : memref<1x16x12x18xf32, #tpu.memory_space<vmem>>, vector<1x1x12x18xf32>
    %39 = vector.shape_cast %38 : vector<1x1x12x18xf32> to vector<12x18xf32>
    %40 = vector.extract_strided_slice %39 {offsets = [0, 0], sizes = [12, 16], strides = [1, 1]} : vector<12x18xf32> to vector<12x16xf32>
    %41 = vector.extract_strided_slice %39 {offsets = [0, 1], sizes = [12, 16], strides = [1, 1]} : vector<12x18xf32> to vector<12x16xf32>
    %42 = vector.extract_strided_slice %39 {offsets = [0, 2], sizes = [12, 16], strides = [1, 1]} : vector<12x18xf32> to vector<12x16xf32>
    %43 = tpu.concatenate %40, %41, %42 in 0 : vector<12x16xf32>, vector<12x16xf32>, vector<12x16xf32> -> vector<36x16xf32>
    %cst_30 = arith.constant dense<0.000000e+00> : vector<4x16xf32>
    %44 = tpu.matmul %0, %43, %cst_30 {dimension_numbers = #tpu.dot_dimension_numbers<[1], [0], [0], [1], [0, 0, 1, 1], [], []>} : vector<4x36xf32>, vector<36x16xf32>, vector<4x16xf32> -> vector<4x16xf32>
    %45 = vector.broadcast %1 : vector<4x1xf32> to vector<4x16xf32>
    %46 = arith.addf %44, %45 : vector<4x16xf32>
    %c0_31 = arith.constant 0 : index
    %c3_32 = arith.constant 3 : index
    %c0_33 = arith.constant 0 : index
    %c0_34 = arith.constant 0 : index
    %47 = vector.load %arg5[%c0_31, %c3_32, %c0_33, %c0_34] : memref<1x16x4x16xf32, #tpu.memory_space<vmem>>, vector<1x1x4x16xf32>
    %48 = vector.shape_cast %47 : vector<1x1x4x16xf32> to vector<4x16xf32>
    %49 = vector.shape_cast %46 : vector<4x16xf32> to vector<1x1x4x16xf32>
    tpu.vector_store %arg5[%c0_31, %c3_32, %c0_33, %c0_34], %49 {strides = array<i32>} : memref<1x16x4x16xf32, #tpu.memory_space<vmem>>, vector<1x1x4x16xf32>,
    %c0_35 = arith.constant 0 : index
    %c4 = arith.constant 4 : index
    %c0_36 = arith.constant 0 : index
    %c0_37 = arith.constant 0 : index
    %50 = vector.load %arg2[%c0_35, %c4, %c0_36, %c0_37] : memref<1x16x12x18xf32, #tpu.memory_space<vmem>>, vector<1x1x12x18xf32>
    %51 = vector.shape_cast %50 : vector<1x1x12x18xf32> to vector<12x18xf32>
    %52 = vector.extract_strided_slice %51 {offsets = [0, 0], sizes = [12, 16], strides = [1, 1]} : vector<12x18xf32> to vector<12x16xf32>
    %53 = vector.extract_strided_slice %51 {offsets = [0, 1], sizes = [12, 16], strides = [1, 1]} : vector<12x18xf32> to vector<12x16xf32>
    %54 = vector.extract_strided_slice %51 {offsets = [0, 2], sizes = [12, 16], strides = [1, 1]} : vector<12x18xf32> to vector<12x16xf32>
    %55 = tpu.concatenate %52, %53, %54 in 0 : vector<12x16xf32>, vector<12x16xf32>, vector<12x16xf32> -> vector<36x16xf32>
    %cst_38 = arith.constant dense<0.000000e+00> : vector<4x16xf32>
    %56 = tpu.matmul %0, %55, %cst_38 {dimension_numbers = #tpu.dot_dimension_numbers<[1], [0], [0], [1], [0, 0, 1, 1], [], []>} : vector<4x36xf32>, vector<36x16xf32>, vector<4x16xf32> -> vector<4x16xf32>
    %57 = vector.broadcast %1 : vector<4x1xf32> to vector<4x16xf32>
    %58 = arith.addf %56, %57 : vector<4x16xf32>
    %c0_39 = arith.constant 0 : index
    %c4_40 = arith.constant 4 : index
    %c0_41 = arith.constant 0 : index
    %c0_42 = arith.constant 0 : index
    %59 = vector.load %arg5[%c0_39, %c4_40, %c0_41, %c0_42] : memref<1x16x4x16xf32, #tpu.memory_space<vmem>>, vector<1x1x4x16xf32>
    %60 = vector.shape_cast %59 : vector<1x1x4x16xf32> to vector<4x16xf32>
    %61 = vector.shape_cast %58 : vector<4x16xf32> to vector<1x1x4x16xf32>
    tpu.vector_store %arg5[%c0_39, %c4_40, %c0_41, %c0_42], %61 {strides = array<i32>} : memref<1x16x4x16xf32, #tpu.memory_space<vmem>>, vector<1x1x4x16xf32>,
    %c0_43 = arith.constant 0 : index
    %c5 = arith.constant 5 : index
    %c0_44 = arith.constant 0 : index
    %c0_45 = arith.constant 0 : index
    %62 = vector.load %arg2[%c0_43, %c5, %c0_44, %c0_45] : memref<1x16x12x18xf32, #tpu.memory_space<vmem>>, vector<1x1x12x18xf32>
    %63 = vector.shape_cast %62 : vector<1x1x12x18xf32> to vector<12x18xf32>
    %64 = vector.extract_strided_slice %63 {offsets = [0, 0], sizes = [12, 16], strides = [1, 1]} : vector<12x18xf32> to vector<12x16xf32>
    %65 = vector.extract_strided_slice %63 {offsets = [0, 1], sizes = [12, 16], strides = [1, 1]} : vector<12x18xf32> to vector<12x16xf32>
    %66 = vector.extract_strided_slice %63 {offsets = [0, 2], sizes = [12, 16], strides = [1, 1]} : vector<12x18xf32> to vector<12x16xf32>
    %67 = tpu.concatenate %64, %65, %66 in 0 : vector<12x16xf32>, vector<12x16xf32>, vector<12x16xf32> -> vector<36x16xf32>
    %cst_46 = arith.constant dense<0.000000e+00> : vector<4x16xf32>
    %68 = tpu.matmul %0, %67, %cst_46 {dimension_numbers = #tpu.dot_dimension_numbers<[1], [0], [0], [1], [0, 0, 1, 1], [], []>} : vector<4x36xf32>, vector<36x16xf32>, vector<4x16xf32> -> vector<4x16xf32>
    %69 = vector.broadcast %1 : vector<4x1xf32> to vector<4x16xf32>
    %70 = arith.addf %68, %69 : vector<4x16xf32>
    %c0_47 = arith.constant 0 : index
    %c5_48 = arith.constant 5 : index
    %c0_49 = arith.constant 0 : index
    %c0_50 = arith.constant 0 : index
    %71 = vector.load %arg5[%c0_47, %c5_48, %c0_49, %c0_50] : memref<1x16x4x16xf32, #tpu.memory_space<vmem>>, vector<1x1x4x16xf32>
    %72 = vector.shape_cast %71 : vector<1x1x4x16xf32> to vector<4x16xf32>
    %73 = vector.shape_cast %70 : vector<4x16xf32> to vector<1x1x4x16xf32>
    tpu.vector_store %arg5[%c0_47, %c5_48, %c0_49, %c0_50], %73 {strides = array<i32>} : memref<1x16x4x16xf32, #tpu.memory_space<vmem>>, vector<1x1x4x16xf32>,
    %c0_51 = arith.constant 0 : index
    %c6 = arith.constant 6 : index
    %c0_52 = arith.constant 0 : index
    %c0_53 = arith.constant 0 : index
    %74 = vector.load %arg2[%c0_51, %c6, %c0_52, %c0_53] : memref<1x16x12x18xf32, #tpu.memory_space<vmem>>, vector<1x1x12x18xf32>
    %75 = vector.shape_cast %74 : vector<1x1x12x18xf32> to vector<12x18xf32>
    %76 = vector.extract_strided_slice %75 {offsets = [0, 0], sizes = [12, 16], strides = [1, 1]} : vector<12x18xf32> to vector<12x16xf32>
    %77 = vector.extract_strided_slice %75 {offsets = [0, 1], sizes = [12, 16], strides = [1, 1]} : vector<12x18xf32> to vector<12x16xf32>
    %78 = vector.extract_strided_slice %75 {offsets = [0, 2], sizes = [12, 16], strides = [1, 1]} : vector<12x18xf32> to vector<12x16xf32>
    %79 = tpu.concatenate %76, %77, %78 in 0 : vector<12x16xf32>, vector<12x16xf32>, vector<12x16xf32> -> vector<36x16xf32>
    %cst_54 = arith.constant dense<0.000000e+00> : vector<4x16xf32>
    %80 = tpu.matmul %0, %79, %cst_54 {dimension_numbers = #tpu.dot_dimension_numbers<[1], [0], [0], [1], [0, 0, 1, 1], [], []>} : vector<4x36xf32>, vector<36x16xf32>, vector<4x16xf32> -> vector<4x16xf32>
    %81 = vector.broadcast %1 : vector<4x1xf32> to vector<4x16xf32>
    %82 = arith.addf %80, %81 : vector<4x16xf32>
    %c0_55 = arith.constant 0 : index
    %c6_56 = arith.constant 6 : index
    %c0_57 = arith.constant 0 : index
    %c0_58 = arith.constant 0 : index
    %83 = vector.load %arg5[%c0_55, %c6_56, %c0_57, %c0_58] : memref<1x16x4x16xf32, #tpu.memory_space<vmem>>, vector<1x1x4x16xf32>
    %84 = vector.shape_cast %83 : vector<1x1x4x16xf32> to vector<4x16xf32>
    %85 = vector.shape_cast %82 : vector<4x16xf32> to vector<1x1x4x16xf32>
    tpu.vector_store %arg5[%c0_55, %c6_56, %c0_57, %c0_58], %85 {strides = array<i32>} : memref<1x16x4x16xf32, #tpu.memory_space<vmem>>, vector<1x1x4x16xf32>,
    %c0_59 = arith.constant 0 : index
    %c7 = arith.constant 7 : index
    %c0_60 = arith.constant 0 : index
    %c0_61 = arith.constant 0 : index
    %86 = vector.load %arg2[%c0_59, %c7, %c0_60, %c0_61] : memref<1x16x12x18xf32, #tpu.memory_space<vmem>>, vector<1x1x12x18xf32>
    %87 = vector.shape_cast %86 : vector<1x1x12x18xf32> to vector<12x18xf32>
    %88 = vector.extract_strided_slice %87 {offsets = [0, 0], sizes = [12, 16], strides = [1, 1]} : vector<12x18xf32> to vector<12x16xf32>
    %89 = vector.extract_strided_slice %87 {offsets = [0, 1], sizes = [12, 16], strides = [1, 1]} : vector<12x18xf32> to vector<12x16xf32>
    %90 = vector.extract_strided_slice %87 {offsets = [0, 2], sizes = [12, 16], strides = [1, 1]} : vector<12x18xf32> to vector<12x16xf32>
    %91 = tpu.concatenate %88, %89, %90 in 0 : vector<12x16xf32>, vector<12x16xf32>, vector<12x16xf32> -> vector<36x16xf32>
    %cst_62 = arith.constant dense<0.000000e+00> : vector<4x16xf32>
    %92 = tpu.matmul %0, %91, %cst_62 {dimension_numbers = #tpu.dot_dimension_numbers<[1], [0], [0], [1], [0, 0, 1, 1], [], []>} : vector<4x36xf32>, vector<36x16xf32>, vector<4x16xf32> -> vector<4x16xf32>
    %93 = vector.broadcast %1 : vector<4x1xf32> to vector<4x16xf32>
    %94 = arith.addf %92, %93 : vector<4x16xf32>
    %c0_63 = arith.constant 0 : index
    %c7_64 = arith.constant 7 : index
    %c0_65 = arith.constant 0 : index
    %c0_66 = arith.constant 0 : index
    %95 = vector.load %arg5[%c0_63, %c7_64, %c0_65, %c0_66] : memref<1x16x4x16xf32, #tpu.memory_space<vmem>>, vector<1x1x4x16xf32>
    %96 = vector.shape_cast %95 : vector<1x1x4x16xf32> to vector<4x16xf32>
    %97 = vector.shape_cast %94 : vector<4x16xf32> to vector<1x1x4x16xf32>
    tpu.vector_store %arg5[%c0_63, %c7_64, %c0_65, %c0_66], %97 {strides = array<i32>} : memref<1x16x4x16xf32, #tpu.memory_space<vmem>>, vector<1x1x4x16xf32>,
    %c0_67 = arith.constant 0 : index
    %c8 = arith.constant 8 : index
    %c0_68 = arith.constant 0 : index
    %c0_69 = arith.constant 0 : index
    %98 = vector.load %arg2[%c0_67, %c8, %c0_68, %c0_69] : memref<1x16x12x18xf32, #tpu.memory_space<vmem>>, vector<1x1x12x18xf32>
    %99 = vector.shape_cast %98 : vector<1x1x12x18xf32> to vector<12x18xf32>
    %100 = vector.extract_strided_slice %99 {offsets = [0, 0], sizes = [12, 16], strides = [1, 1]} : vector<12x18xf32> to vector<12x16xf32>
    %101 = vector.extract_strided_slice %99 {offsets = [0, 1], sizes = [12, 16], strides = [1, 1]} : vector<12x18xf32> to vector<12x16xf32>
    %102 = vector.extract_strided_slice %99 {offsets = [0, 2], sizes = [12, 16], strides = [1, 1]} : vector<12x18xf32> to vector<12x16xf32>
    %103 = tpu.concatenate %100, %101, %102 in 0 : vector<12x16xf32>, vector<12x16xf32>, vector<12x16xf32> -> vector<36x16xf32>
    %cst_70 = arith.constant dense<0.000000e+00> : vector<4x16xf32>
    %104 = tpu.matmul %0, %103, %cst_70 {dimension_numbers = #tpu.dot_dimension_numbers<[1], [0], [0], [1], [0, 0, 1, 1], [], []>} : vector<4x36xf32>, vector<36x16xf32>, vector<4x16xf32> -> vector<4x16xf32>
    %105 = vector.broadcast %1 : vector<4x1xf32> to vector<4x16xf32>
    %106 = arith.addf %104, %105 : vector<4x16xf32>
    %c0_71 = arith.constant 0 : index
    %c8_72 = arith.constant 8 : index
    %c0_73 = arith.constant 0 : index
    %c0_74 = arith.constant 0 : index
    %107 = vector.load %arg5[%c0_71, %c8_72, %c0_73, %c0_74] : memref<1x16x4x16xf32, #tpu.memory_space<vmem>>, vector<1x1x4x16xf32>
    %108 = vector.shape_cast %107 : vector<1x1x4x16xf32> to vector<4x16xf32>
    %109 = vector.shape_cast %106 : vector<4x16xf32> to vector<1x1x4x16xf32>
    tpu.vector_store %arg5[%c0_71, %c8_72, %c0_73, %c0_74], %109 {strides = array<i32>} : memref<1x16x4x16xf32, #tpu.memory_space<vmem>>, vector<1x1x4x16xf32>,
    %c0_75 = arith.constant 0 : index
    %c9 = arith.constant 9 : index
    %c0_76 = arith.constant 0 : index
    %c0_77 = arith.constant 0 : index
    %110 = vector.load %arg2[%c0_75, %c9, %c0_76, %c0_77] : memref<1x16x12x18xf32, #tpu.memory_space<vmem>>, vector<1x1x12x18xf32>
    %111 = vector.shape_cast %110 : vector<1x1x12x18xf32> to vector<12x18xf32>
    %112 = vector.extract_strided_slice %111 {offsets = [0, 0], sizes = [12, 16], strides = [1, 1]} : vector<12x18xf32> to vector<12x16xf32>
    %113 = vector.extract_strided_slice %111 {offsets = [0, 1], sizes = [12, 16], strides = [1, 1]} : vector<12x18xf32> to vector<12x16xf32>
    %114 = vector.extract_strided_slice %111 {offsets = [0, 2], sizes = [12, 16], strides = [1, 1]} : vector<12x18xf32> to vector<12x16xf32>
    %115 = tpu.concatenate %112, %113, %114 in 0 : vector<12x16xf32>, vector<12x16xf32>, vector<12x16xf32> -> vector<36x16xf32>
    %cst_78 = arith.constant dense<0.000000e+00> : vector<4x16xf32>
    %116 = tpu.matmul %0, %115, %cst_78 {dimension_numbers = #tpu.dot_dimension_numbers<[1], [0], [0], [1], [0, 0, 1, 1], [], []>} : vector<4x36xf32>, vector<36x16xf32>, vector<4x16xf32> -> vector<4x16xf32>
    %117 = vector.broadcast %1 : vector<4x1xf32> to vector<4x16xf32>
    %118 = arith.addf %116, %117 : vector<4x16xf32>
    %c0_79 = arith.constant 0 : index
    %c9_80 = arith.constant 9 : index
    %c0_81 = arith.constant 0 : index
    %c0_82 = arith.constant 0 : index
    %119 = vector.load %arg5[%c0_79, %c9_80, %c0_81, %c0_82] : memref<1x16x4x16xf32, #tpu.memory_space<vmem>>, vector<1x1x4x16xf32>
    %120 = vector.shape_cast %119 : vector<1x1x4x16xf32> to vector<4x16xf32>
    %121 = vector.shape_cast %118 : vector<4x16xf32> to vector<1x1x4x16xf32>
    tpu.vector_store %arg5[%c0_79, %c9_80, %c0_81, %c0_82], %121 {strides = array<i32>} : memref<1x16x4x16xf32, #tpu.memory_space<vmem>>, vector<1x1x4x16xf32>,
    %c0_83 = arith.constant 0 : index
    %c10 = arith.constant 10 : index
    %c0_84 = arith.constant 0 : index
    %c0_85 = arith.constant 0 : index
    %122 = vector.load %arg2[%c0_83, %c10, %c0_84, %c0_85] : memref<1x16x12x18xf32, #tpu.memory_space<vmem>>, vector<1x1x12x18xf32>
    %123 = vector.shape_cast %122 : vector<1x1x12x18xf32> to vector<12x18xf32>
    %124 = vector.extract_strided_slice %123 {offsets = [0, 0], sizes = [12, 16], strides = [1, 1]} : vector<12x18xf32> to vector<12x16xf32>
    %125 = vector.extract_strided_slice %123 {offsets = [0, 1], sizes = [12, 16], strides = [1, 1]} : vector<12x18xf32> to vector<12x16xf32>
    %126 = vector.extract_strided_slice %123 {offsets = [0, 2], sizes = [12, 16], strides = [1, 1]} : vector<12x18xf32> to vector<12x16xf32>
    %127 = tpu.concatenate %124, %125, %126 in 0 : vector<12x16xf32>, vector<12x16xf32>, vector<12x16xf32> -> vector<36x16xf32>
    %cst_86 = arith.constant dense<0.000000e+00> : vector<4x16xf32>
    %128 = tpu.matmul %0, %127, %cst_86 {dimension_numbers = #tpu.dot_dimension_numbers<[1], [0], [0], [1], [0, 0, 1, 1], [], []>} : vector<4x36xf32>, vector<36x16xf32>, vector<4x16xf32> -> vector<4x16xf32>
    %129 = vector.broadcast %1 : vector<4x1xf32> to vector<4x16xf32>
    %130 = arith.addf %128, %129 : vector<4x16xf32>
    %c0_87 = arith.constant 0 : index
    %c10_88 = arith.constant 10 : index
    %c0_89 = arith.constant 0 : index
    %c0_90 = arith.constant 0 : index
    %131 = vector.load %arg5[%c0_87, %c10_88, %c0_89, %c0_90] : memref<1x16x4x16xf32, #tpu.memory_space<vmem>>, vector<1x1x4x16xf32>
    %132 = vector.shape_cast %131 : vector<1x1x4x16xf32> to vector<4x16xf32>
    %133 = vector.shape_cast %130 : vector<4x16xf32> to vector<1x1x4x16xf32>
    tpu.vector_store %arg5[%c0_87, %c10_88, %c0_89, %c0_90], %133 {strides = array<i32>} : memref<1x16x4x16xf32, #tpu.memory_space<vmem>>, vector<1x1x4x16xf32>,
    %c0_91 = arith.constant 0 : index
    %c11 = arith.constant 11 : index
    %c0_92 = arith.constant 0 : index
    %c0_93 = arith.constant 0 : index
    %134 = vector.load %arg2[%c0_91, %c11, %c0_92, %c0_93] : memref<1x16x12x18xf32, #tpu.memory_space<vmem>>, vector<1x1x12x18xf32>
    %135 = vector.shape_cast %134 : vector<1x1x12x18xf32> to vector<12x18xf32>
    %136 = vector.extract_strided_slice %135 {offsets = [0, 0], sizes = [12, 16], strides = [1, 1]} : vector<12x18xf32> to vector<12x16xf32>
    %137 = vector.extract_strided_slice %135 {offsets = [0, 1], sizes = [12, 16], strides = [1, 1]} : vector<12x18xf32> to vector<12x16xf32>
    %138 = vector.extract_strided_slice %135 {offsets = [0, 2], sizes = [12, 16], strides = [1, 1]} : vector<12x18xf32> to vector<12x16xf32>
    %139 = tpu.concatenate %136, %137, %138 in 0 : vector<12x16xf32>, vector<12x16xf32>, vector<12x16xf32> -> vector<36x16xf32>
    %cst_94 = arith.constant dense<0.000000e+00> : vector<4x16xf32>
    %140 = tpu.matmul %0, %139, %cst_94 {dimension_numbers = #tpu.dot_dimension_numbers<[1], [0], [0], [1], [0, 0, 1, 1], [], []>} : vector<4x36xf32>, vector<36x16xf32>, vector<4x16xf32> -> vector<4x16xf32>
    %141 = vector.broadcast %1 : vector<4x1xf32> to vector<4x16xf32>
    %142 = arith.addf %140, %141 : vector<4x16xf32>
    %c0_95 = arith.constant 0 : index
    %c11_96 = arith.constant 11 : index
    %c0_97 = arith.constant 0 : index
    %c0_98 = arith.constant 0 : index
    %143 = vector.load %arg5[%c0_95, %c11_96, %c0_97, %c0_98] : memref<1x16x4x16xf32, #tpu.memory_space<vmem>>, vector<1x1x4x16xf32>
    %144 = vector.shape_cast %143 : vector<1x1x4x16xf32> to vector<4x16xf32>
    %145 = vector.shape_cast %142 : vector<4x16xf32> to vector<1x1x4x16xf32>
    tpu.vector_store %arg5[%c0_95, %c11_96, %c0_97, %c0_98], %145 {strides = array<i32>} : memref<1x16x4x16xf32, #tpu.memory_space<vmem>>, vector<1x1x4x16xf32>,
    %c0_99 = arith.constant 0 : index
    %c12 = arith.constant 12 : index
    %c0_100 = arith.constant 0 : index
    %c0_101 = arith.constant 0 : index
    %146 = vector.load %arg2[%c0_99, %c12, %c0_100, %c0_101] : memref<1x16x12x18xf32, #tpu.memory_space<vmem>>, vector<1x1x12x18xf32>
    %147 = vector.shape_cast %146 : vector<1x1x12x18xf32> to vector<12x18xf32>
    %148 = vector.extract_strided_slice %147 {offsets = [0, 0], sizes = [12, 16], strides = [1, 1]} : vector<12x18xf32> to vector<12x16xf32>
    %149 = vector.extract_strided_slice %147 {offsets = [0, 1], sizes = [12, 16], strides = [1, 1]} : vector<12x18xf32> to vector<12x16xf32>
    %150 = vector.extract_strided_slice %147 {offsets = [0, 2], sizes = [12, 16], strides = [1, 1]} : vector<12x18xf32> to vector<12x16xf32>
    %151 = tpu.concatenate %148, %149, %150 in 0 : vector<12x16xf32>, vector<12x16xf32>, vector<12x16xf32> -> vector<36x16xf32>
    %cst_102 = arith.constant dense<0.000000e+00> : vector<4x16xf32>
    %152 = tpu.matmul %0, %151, %cst_102 {dimension_numbers = #tpu.dot_dimension_numbers<[1], [0], [0], [1], [0, 0, 1, 1], [], []>} : vector<4x36xf32>, vector<36x16xf32>, vector<4x16xf32> -> vector<4x16xf32>
    %153 = vector.broadcast %1 : vector<4x1xf32> to vector<4x16xf32>
    %154 = arith.addf %152, %153 : vector<4x16xf32>
    %c0_103 = arith.constant 0 : index
    %c12_104 = arith.constant 12 : index
    %c0_105 = arith.constant 0 : index
    %c0_106 = arith.constant 0 : index
    %155 = vector.load %arg5[%c0_103, %c12_104, %c0_105, %c0_106] : memref<1x16x4x16xf32, #tpu.memory_space<vmem>>, vector<1x1x4x16xf32>
    %156 = vector.shape_cast %155 : vector<1x1x4x16xf32> to vector<4x16xf32>
    %157 = vector.shape_cast %154 : vector<4x16xf32> to vector<1x1x4x16xf32>
    tpu.vector_store %arg5[%c0_103, %c12_104, %c0_105, %c0_106], %157 {strides = array<i32>} : memref<1x16x4x16xf32, #tpu.memory_space<vmem>>, vector<1x1x4x16xf32>,
    %c0_107 = arith.constant 0 : index
    %c13 = arith.constant 13 : index
    %c0_108 = arith.constant 0 : index
    %c0_109 = arith.constant 0 : index
    %158 = vector.load %arg2[%c0_107, %c13, %c0_108, %c0_109] : memref<1x16x12x18xf32, #tpu.memory_space<vmem>>, vector<1x1x12x18xf32>
    %159 = vector.shape_cast %158 : vector<1x1x12x18xf32> to vector<12x18xf32>
    %160 = vector.extract_strided_slice %159 {offsets = [0, 0], sizes = [12, 16], strides = [1, 1]} : vector<12x18xf32> to vector<12x16xf32>
    %161 = vector.extract_strided_slice %159 {offsets = [0, 1], sizes = [12, 16], strides = [1, 1]} : vector<12x18xf32> to vector<12x16xf32>
    %162 = vector.extract_strided_slice %159 {offsets = [0, 2], sizes = [12, 16], strides = [1, 1]} : vector<12x18xf32> to vector<12x16xf32>
    %163 = tpu.concatenate %160, %161, %162 in 0 : vector<12x16xf32>, vector<12x16xf32>, vector<12x16xf32> -> vector<36x16xf32>
    %cst_110 = arith.constant dense<0.000000e+00> : vector<4x16xf32>
    %164 = tpu.matmul %0, %163, %cst_110 {dimension_numbers = #tpu.dot_dimension_numbers<[1], [0], [0], [1], [0, 0, 1, 1], [], []>} : vector<4x36xf32>, vector<36x16xf32>, vector<4x16xf32> -> vector<4x16xf32>
    %165 = vector.broadcast %1 : vector<4x1xf32> to vector<4x16xf32>
    %166 = arith.addf %164, %165 : vector<4x16xf32>
    %c0_111 = arith.constant 0 : index
    %c13_112 = arith.constant 13 : index
    %c0_113 = arith.constant 0 : index
    %c0_114 = arith.constant 0 : index
    %167 = vector.load %arg5[%c0_111, %c13_112, %c0_113, %c0_114] : memref<1x16x4x16xf32, #tpu.memory_space<vmem>>, vector<1x1x4x16xf32>
    %168 = vector.shape_cast %167 : vector<1x1x4x16xf32> to vector<4x16xf32>
    %169 = vector.shape_cast %166 : vector<4x16xf32> to vector<1x1x4x16xf32>
    tpu.vector_store %arg5[%c0_111, %c13_112, %c0_113, %c0_114], %169 {strides = array<i32>} : memref<1x16x4x16xf32, #tpu.memory_space<vmem>>, vector<1x1x4x16xf32>,
    %c0_115 = arith.constant 0 : index
    %c14 = arith.constant 14 : index
    %c0_116 = arith.constant 0 : index
    %c0_117 = arith.constant 0 : index
    %170 = vector.load %arg2[%c0_115, %c14, %c0_116, %c0_117] : memref<1x16x12x18xf32, #tpu.memory_space<vmem>>, vector<1x1x12x18xf32>
    %171 = vector.shape_cast %170 : vector<1x1x12x18xf32> to vector<12x18xf32>
    %172 = vector.extract_strided_slice %171 {offsets = [0, 0], sizes = [12, 16], strides = [1, 1]} : vector<12x18xf32> to vector<12x16xf32>
    %173 = vector.extract_strided_slice %171 {offsets = [0, 1], sizes = [12, 16], strides = [1, 1]} : vector<12x18xf32> to vector<12x16xf32>
    %174 = vector.extract_strided_slice %171 {offsets = [0, 2], sizes = [12, 16], strides = [1, 1]} : vector<12x18xf32> to vector<12x16xf32>
    %175 = tpu.concatenate %172, %173, %174 in 0 : vector<12x16xf32>, vector<12x16xf32>, vector<12x16xf32> -> vector<36x16xf32>
    %cst_118 = arith.constant dense<0.000000e+00> : vector<4x16xf32>
    %176 = tpu.matmul %0, %175, %cst_118 {dimension_numbers = #tpu.dot_dimension_numbers<[1], [0], [0], [1], [0, 0, 1, 1], [], []>} : vector<4x36xf32>, vector<36x16xf32>, vector<4x16xf32> -> vector<4x16xf32>
    %177 = vector.broadcast %1 : vector<4x1xf32> to vector<4x16xf32>
    %178 = arith.addf %176, %177 : vector<4x16xf32>
    %c0_119 = arith.constant 0 : index
    %c14_120 = arith.constant 14 : index
    %c0_121 = arith.constant 0 : index
    %c0_122 = arith.constant 0 : index
    %179 = vector.load %arg5[%c0_119, %c14_120, %c0_121, %c0_122] : memref<1x16x4x16xf32, #tpu.memory_space<vmem>>, vector<1x1x4x16xf32>
    %180 = vector.shape_cast %179 : vector<1x1x4x16xf32> to vector<4x16xf32>
    %181 = vector.shape_cast %178 : vector<4x16xf32> to vector<1x1x4x16xf32>
    tpu.vector_store %arg5[%c0_119, %c14_120, %c0_121, %c0_122], %181 {strides = array<i32>} : memref<1x16x4x16xf32, #tpu.memory_space<vmem>>, vector<1x1x4x16xf32>,
    %c0_123 = arith.constant 0 : index
    %c15 = arith.constant 15 : index
    %c0_124 = arith.constant 0 : index
    %c0_125 = arith.constant 0 : index
    %182 = vector.load %arg2[%c0_123, %c15, %c0_124, %c0_125] : memref<1x16x12x18xf32, #tpu.memory_space<vmem>>, vector<1x1x12x18xf32>
    %183 = vector.shape_cast %182 : vector<1x1x12x18xf32> to vector<12x18xf32>
    %184 = vector.extract_strided_slice %183 {offsets = [0, 0], sizes = [12, 16], strides = [1, 1]} : vector<12x18xf32> to vector<12x16xf32>
    %185 = vector.extract_strided_slice %183 {offsets = [0, 1], sizes = [12, 16], strides = [1, 1]} : vector<12x18xf32> to vector<12x16xf32>
    %186 = vector.extract_strided_slice %183 {offsets = [0, 2], sizes = [12, 16], strides = [1, 1]} : vector<12x18xf32> to vector<12x16xf32>
    %187 = tpu.concatenate %184, %185, %186 in 0 : vector<12x16xf32>, vector<12x16xf32>, vector<12x16xf32> -> vector<36x16xf32>
    %cst_126 = arith.constant dense<0.000000e+00> : vector<4x16xf32>
    %188 = tpu.matmul %0, %187, %cst_126 {dimension_numbers = #tpu.dot_dimension_numbers<[1], [0], [0], [1], [0, 0, 1, 1], [], []>} : vector<4x36xf32>, vector<36x16xf32>, vector<4x16xf32> -> vector<4x16xf32>
    %189 = vector.broadcast %1 : vector<4x1xf32> to vector<4x16xf32>
    %190 = arith.addf %188, %189 : vector<4x16xf32>
    %c0_127 = arith.constant 0 : index
    %c15_128 = arith.constant 15 : index
    %c0_129 = arith.constant 0 : index
    %c0_130 = arith.constant 0 : index
    %191 = vector.load %arg5[%c0_127, %c15_128, %c0_129, %c0_130] : memref<1x16x4x16xf32, #tpu.memory_space<vmem>>, vector<1x1x4x16xf32>
    %192 = vector.shape_cast %191 : vector<1x1x4x16xf32> to vector<4x16xf32>
    %193 = vector.shape_cast %190 : vector<4x16xf32> to vector<1x1x4x16xf32>
    tpu.vector_store %arg5[%c0_127, %c15_128, %c0_129, %c0_130], %193 {strides = array<i32>} : memref<1x16x4x16xf32, #tpu.memory_space<vmem>>, vector<1x1x4x16xf32>,
    return
  }
  func.func @transform_0(%arg0: i32, %arg1: i32) -> (i32, i32, i32, i32) {
    %c0_i32 = arith.constant 0 : i32
    %c0_i32_0 = arith.constant 0 : i32
    %c0_i32_1 = arith.constant 0 : i32
    return %arg0, %arg1, %c0_i32, %c0_i32_0 : i32, i32, i32, i32
  }
  func.func @transform_1(%arg0: i32, %arg1: i32) -> (i32, i32) {
    %c0_i32 = arith.constant 0 : i32
    %c0_i32_0 = arith.constant 0 : i32
    %c0_i32_1 = arith.constant 0 : i32
    return %c0_i32, %c0_i32_0 : i32, i32
  }
  func.func @transform_2(%arg0: i32, %arg1: i32) -> (i32, i32) {
    %c0_i32 = arith.constant 0 : i32
    %c0_i32_0 = arith.constant 0 : i32
    %c0_i32_1 = arith.constant 0 : i32
    return %c0_i32, %c0_i32_0 : i32, i32
  }
  func.func @transform_3(%arg0: i32, %arg1: i32) -> (i32, i32, i32, i32) {
    %c0_i32 = arith.constant 0 : i32
    %c0_i32_0 = arith.constant 0 : i32
    %c0_i32_1 = arith.constant 0 : i32
    return %arg0, %arg1, %c0_i32, %c0_i32_0 : i32, i32, i32, i32
  }
}

module attributes {stable_mosaic.version = 11 : i64} {
  func.func @_conv3x3_row_gemm_kernel(%arg0: i32, %arg1: i32, %arg2: memref<1x8x48x10xf32, #tpu.memory_space<vmem>>, %arg3: memref<16x144xf32, #tpu.memory_space<vmem>>, %arg4: memref<16x1xf32, #tpu.memory_space<vmem>>, %arg5: memref<1x8x16x8xf32, #tpu.memory_space<vmem>>) attributes {dimension_semantics = [#tpu.dimension_semantics<parallel>, #tpu.dimension_semantics<parallel>], iteration_bounds = array<i64: 2, 1>, scalar_prefetch = 0 : i64, scratch_operands = 0 : i64, tpu.core_type = #tpu.core_type<tc>, window_params = [{transform_indices = @transform_0, window_bounds = array<i64: 1, 8, 48, 10>}, {pipeline_mode = #tpu.pipeline_mode<synchronous>, transform_indices = @transform_1, window_bounds = array<i64: 16, 144>}, {pipeline_mode = #tpu.pipeline_mode<synchronous>, transform_indices = @transform_2, window_bounds = array<i64: 16, 1>}, {transform_indices = @transform_3, window_bounds = array<i64: 1, 8, 16, 8>}]} {
    %c0 = arith.constant 0 : index
    %c0_0 = arith.constant 0 : index
    %0 = vector.load %arg3[%c0, %c0_0] : memref<16x144xf32, #tpu.memory_space<vmem>>, vector<16x144xf32>
    %c0_1 = arith.constant 0 : index
    %c0_2 = arith.constant 0 : index
    %1 = vector.load %arg4[%c0_1, %c0_2] : memref<16x1xf32, #tpu.memory_space<vmem>>, vector<16x1xf32>
    %c0_3 = arith.constant 0 : index
    %c0_4 = arith.constant 0 : index
    %c0_5 = arith.constant 0 : index
    %c0_6 = arith.constant 0 : index
    %2 = vector.load %arg2[%c0_3, %c0_4, %c0_5, %c0_6] : memref<1x8x48x10xf32, #tpu.memory_space<vmem>>, vector<1x1x48x10xf32>
    %3 = vector.shape_cast %2 : vector<1x1x48x10xf32> to vector<48x10xf32>
    %4 = vector.extract_strided_slice %3 {offsets = [0, 0], sizes = [48, 8], strides = [1, 1]} : vector<48x10xf32> to vector<48x8xf32>
    %5 = vector.extract_strided_slice %3 {offsets = [0, 1], sizes = [48, 8], strides = [1, 1]} : vector<48x10xf32> to vector<48x8xf32>
    %6 = vector.extract_strided_slice %3 {offsets = [0, 2], sizes = [48, 8], strides = [1, 1]} : vector<48x10xf32> to vector<48x8xf32>
    %7 = tpu.concatenate %4, %5, %6 in 0 : vector<48x8xf32>, vector<48x8xf32>, vector<48x8xf32> -> vector<144x8xf32>
    %cst = arith.constant dense<0.000000e+00> : vector<16x8xf32>
    %8 = tpu.matmul %0, %7, %cst {dimension_numbers = #tpu.dot_dimension_numbers<[1], [0], [0], [1], [0, 0, 1, 1], [], []>} : vector<16x144xf32>, vector<144x8xf32>, vector<16x8xf32> -> vector<16x8xf32>
    %9 = vector.broadcast %1 : vector<16x1xf32> to vector<16x8xf32>
    %10 = arith.addf %8, %9 : vector<16x8xf32>
    %c0_7 = arith.constant 0 : index
    %c0_8 = arith.constant 0 : index
    %c0_9 = arith.constant 0 : index
    %c0_10 = arith.constant 0 : index
    %11 = vector.load %arg5[%c0_7, %c0_8, %c0_9, %c0_10] : memref<1x8x16x8xf32, #tpu.memory_space<vmem>>, vector<1x1x16x8xf32>
    %12 = vector.shape_cast %11 : vector<1x1x16x8xf32> to vector<16x8xf32>
    %13 = vector.shape_cast %10 : vector<16x8xf32> to vector<1x1x16x8xf32>
    tpu.vector_store %arg5[%c0_7, %c0_8, %c0_9, %c0_10], %13 {strides = array<i32>} : memref<1x8x16x8xf32, #tpu.memory_space<vmem>>, vector<1x1x16x8xf32>,
    %c0_11 = arith.constant 0 : index
    %c1 = arith.constant 1 : index
    %c0_12 = arith.constant 0 : index
    %c0_13 = arith.constant 0 : index
    %14 = vector.load %arg2[%c0_11, %c1, %c0_12, %c0_13] : memref<1x8x48x10xf32, #tpu.memory_space<vmem>>, vector<1x1x48x10xf32>
    %15 = vector.shape_cast %14 : vector<1x1x48x10xf32> to vector<48x10xf32>
    %16 = vector.extract_strided_slice %15 {offsets = [0, 0], sizes = [48, 8], strides = [1, 1]} : vector<48x10xf32> to vector<48x8xf32>
    %17 = vector.extract_strided_slice %15 {offsets = [0, 1], sizes = [48, 8], strides = [1, 1]} : vector<48x10xf32> to vector<48x8xf32>
    %18 = vector.extract_strided_slice %15 {offsets = [0, 2], sizes = [48, 8], strides = [1, 1]} : vector<48x10xf32> to vector<48x8xf32>
    %19 = tpu.concatenate %16, %17, %18 in 0 : vector<48x8xf32>, vector<48x8xf32>, vector<48x8xf32> -> vector<144x8xf32>
    %cst_14 = arith.constant dense<0.000000e+00> : vector<16x8xf32>
    %20 = tpu.matmul %0, %19, %cst_14 {dimension_numbers = #tpu.dot_dimension_numbers<[1], [0], [0], [1], [0, 0, 1, 1], [], []>} : vector<16x144xf32>, vector<144x8xf32>, vector<16x8xf32> -> vector<16x8xf32>
    %21 = vector.broadcast %1 : vector<16x1xf32> to vector<16x8xf32>
    %22 = arith.addf %20, %21 : vector<16x8xf32>
    %c0_15 = arith.constant 0 : index
    %c1_16 = arith.constant 1 : index
    %c0_17 = arith.constant 0 : index
    %c0_18 = arith.constant 0 : index
    %23 = vector.load %arg5[%c0_15, %c1_16, %c0_17, %c0_18] : memref<1x8x16x8xf32, #tpu.memory_space<vmem>>, vector<1x1x16x8xf32>
    %24 = vector.shape_cast %23 : vector<1x1x16x8xf32> to vector<16x8xf32>
    %25 = vector.shape_cast %22 : vector<16x8xf32> to vector<1x1x16x8xf32>
    tpu.vector_store %arg5[%c0_15, %c1_16, %c0_17, %c0_18], %25 {strides = array<i32>} : memref<1x8x16x8xf32, #tpu.memory_space<vmem>>, vector<1x1x16x8xf32>,
    %c0_19 = arith.constant 0 : index
    %c2 = arith.constant 2 : index
    %c0_20 = arith.constant 0 : index
    %c0_21 = arith.constant 0 : index
    %26 = vector.load %arg2[%c0_19, %c2, %c0_20, %c0_21] : memref<1x8x48x10xf32, #tpu.memory_space<vmem>>, vector<1x1x48x10xf32>
    %27 = vector.shape_cast %26 : vector<1x1x48x10xf32> to vector<48x10xf32>
    %28 = vector.extract_strided_slice %27 {offsets = [0, 0], sizes = [48, 8], strides = [1, 1]} : vector<48x10xf32> to vector<48x8xf32>
    %29 = vector.extract_strided_slice %27 {offsets = [0, 1], sizes = [48, 8], strides = [1, 1]} : vector<48x10xf32> to vector<48x8xf32>
    %30 = vector.extract_strided_slice %27 {offsets = [0, 2], sizes = [48, 8], strides = [1, 1]} : vector<48x10xf32> to vector<48x8xf32>
    %31 = tpu.concatenate %28, %29, %30 in 0 : vector<48x8xf32>, vector<48x8xf32>, vector<48x8xf32> -> vector<144x8xf32>
    %cst_22 = arith.constant dense<0.000000e+00> : vector<16x8xf32>
    %32 = tpu.matmul %0, %31, %cst_22 {dimension_numbers = #tpu.dot_dimension_numbers<[1], [0], [0], [1], [0, 0, 1, 1], [], []>} : vector<16x144xf32>, vector<144x8xf32>, vector<16x8xf32> -> vector<16x8xf32>
    %33 = vector.broadcast %1 : vector<16x1xf32> to vector<16x8xf32>
    %34 = arith.addf %32, %33 : vector<16x8xf32>
    %c0_23 = arith.constant 0 : index
    %c2_24 = arith.constant 2 : index
    %c0_25 = arith.constant 0 : index
    %c0_26 = arith.constant 0 : index
    %35 = vector.load %arg5[%c0_23, %c2_24, %c0_25, %c0_26] : memref<1x8x16x8xf32, #tpu.memory_space<vmem>>, vector<1x1x16x8xf32>
    %36 = vector.shape_cast %35 : vector<1x1x16x8xf32> to vector<16x8xf32>
    %37 = vector.shape_cast %34 : vector<16x8xf32> to vector<1x1x16x8xf32>
    tpu.vector_store %arg5[%c0_23, %c2_24, %c0_25, %c0_26], %37 {strides = array<i32>} : memref<1x8x16x8xf32, #tpu.memory_space<vmem>>, vector<1x1x16x8xf32>,
    %c0_27 = arith.constant 0 : index
    %c3 = arith.constant 3 : index
    %c0_28 = arith.constant 0 : index
    %c0_29 = arith.constant 0 : index
    %38 = vector.load %arg2[%c0_27, %c3, %c0_28, %c0_29] : memref<1x8x48x10xf32, #tpu.memory_space<vmem>>, vector<1x1x48x10xf32>
    %39 = vector.shape_cast %38 : vector<1x1x48x10xf32> to vector<48x10xf32>
    %40 = vector.extract_strided_slice %39 {offsets = [0, 0], sizes = [48, 8], strides = [1, 1]} : vector<48x10xf32> to vector<48x8xf32>
    %41 = vector.extract_strided_slice %39 {offsets = [0, 1], sizes = [48, 8], strides = [1, 1]} : vector<48x10xf32> to vector<48x8xf32>
    %42 = vector.extract_strided_slice %39 {offsets = [0, 2], sizes = [48, 8], strides = [1, 1]} : vector<48x10xf32> to vector<48x8xf32>
    %43 = tpu.concatenate %40, %41, %42 in 0 : vector<48x8xf32>, vector<48x8xf32>, vector<48x8xf32> -> vector<144x8xf32>
    %cst_30 = arith.constant dense<0.000000e+00> : vector<16x8xf32>
    %44 = tpu.matmul %0, %43, %cst_30 {dimension_numbers = #tpu.dot_dimension_numbers<[1], [0], [0], [1], [0, 0, 1, 1], [], []>} : vector<16x144xf32>, vector<144x8xf32>, vector<16x8xf32> -> vector<16x8xf32>
    %45 = vector.broadcast %1 : vector<16x1xf32> to vector<16x8xf32>
    %46 = arith.addf %44, %45 : vector<16x8xf32>
    %c0_31 = arith.constant 0 : index
    %c3_32 = arith.constant 3 : index
    %c0_33 = arith.constant 0 : index
    %c0_34 = arith.constant 0 : index
    %47 = vector.load %arg5[%c0_31, %c3_32, %c0_33, %c0_34] : memref<1x8x16x8xf32, #tpu.memory_space<vmem>>, vector<1x1x16x8xf32>
    %48 = vector.shape_cast %47 : vector<1x1x16x8xf32> to vector<16x8xf32>
    %49 = vector.shape_cast %46 : vector<16x8xf32> to vector<1x1x16x8xf32>
    tpu.vector_store %arg5[%c0_31, %c3_32, %c0_33, %c0_34], %49 {strides = array<i32>} : memref<1x8x16x8xf32, #tpu.memory_space<vmem>>, vector<1x1x16x8xf32>,
    %c0_35 = arith.constant 0 : index
    %c4 = arith.constant 4 : index
    %c0_36 = arith.constant 0 : index
    %c0_37 = arith.constant 0 : index
    %50 = vector.load %arg2[%c0_35, %c4, %c0_36, %c0_37] : memref<1x8x48x10xf32, #tpu.memory_space<vmem>>, vector<1x1x48x10xf32>
    %51 = vector.shape_cast %50 : vector<1x1x48x10xf32> to vector<48x10xf32>
    %52 = vector.extract_strided_slice %51 {offsets = [0, 0], sizes = [48, 8], strides = [1, 1]} : vector<48x10xf32> to vector<48x8xf32>
    %53 = vector.extract_strided_slice %51 {offsets = [0, 1], sizes = [48, 8], strides = [1, 1]} : vector<48x10xf32> to vector<48x8xf32>
    %54 = vector.extract_strided_slice %51 {offsets = [0, 2], sizes = [48, 8], strides = [1, 1]} : vector<48x10xf32> to vector<48x8xf32>
    %55 = tpu.concatenate %52, %53, %54 in 0 : vector<48x8xf32>, vector<48x8xf32>, vector<48x8xf32> -> vector<144x8xf32>
    %cst_38 = arith.constant dense<0.000000e+00> : vector<16x8xf32>
    %56 = tpu.matmul %0, %55, %cst_38 {dimension_numbers = #tpu.dot_dimension_numbers<[1], [0], [0], [1], [0, 0, 1, 1], [], []>} : vector<16x144xf32>, vector<144x8xf32>, vector<16x8xf32> -> vector<16x8xf32>
    %57 = vector.broadcast %1 : vector<16x1xf32> to vector<16x8xf32>
    %58 = arith.addf %56, %57 : vector<16x8xf32>
    %c0_39 = arith.constant 0 : index
    %c4_40 = arith.constant 4 : index
    %c0_41 = arith.constant 0 : index
    %c0_42 = arith.constant 0 : index
    %59 = vector.load %arg5[%c0_39, %c4_40, %c0_41, %c0_42] : memref<1x8x16x8xf32, #tpu.memory_space<vmem>>, vector<1x1x16x8xf32>
    %60 = vector.shape_cast %59 : vector<1x1x16x8xf32> to vector<16x8xf32>
    %61 = vector.shape_cast %58 : vector<16x8xf32> to vector<1x1x16x8xf32>
    tpu.vector_store %arg5[%c0_39, %c4_40, %c0_41, %c0_42], %61 {strides = array<i32>} : memref<1x8x16x8xf32, #tpu.memory_space<vmem>>, vector<1x1x16x8xf32>,
    %c0_43 = arith.constant 0 : index
    %c5 = arith.constant 5 : index
    %c0_44 = arith.constant 0 : index
    %c0_45 = arith.constant 0 : index
    %62 = vector.load %arg2[%c0_43, %c5, %c0_44, %c0_45] : memref<1x8x48x10xf32, #tpu.memory_space<vmem>>, vector<1x1x48x10xf32>
    %63 = vector.shape_cast %62 : vector<1x1x48x10xf32> to vector<48x10xf32>
    %64 = vector.extract_strided_slice %63 {offsets = [0, 0], sizes = [48, 8], strides = [1, 1]} : vector<48x10xf32> to vector<48x8xf32>
    %65 = vector.extract_strided_slice %63 {offsets = [0, 1], sizes = [48, 8], strides = [1, 1]} : vector<48x10xf32> to vector<48x8xf32>
    %66 = vector.extract_strided_slice %63 {offsets = [0, 2], sizes = [48, 8], strides = [1, 1]} : vector<48x10xf32> to vector<48x8xf32>
    %67 = tpu.concatenate %64, %65, %66 in 0 : vector<48x8xf32>, vector<48x8xf32>, vector<48x8xf32> -> vector<144x8xf32>
    %cst_46 = arith.constant dense<0.000000e+00> : vector<16x8xf32>
    %68 = tpu.matmul %0, %67, %cst_46 {dimension_numbers = #tpu.dot_dimension_numbers<[1], [0], [0], [1], [0, 0, 1, 1], [], []>} : vector<16x144xf32>, vector<144x8xf32>, vector<16x8xf32> -> vector<16x8xf32>
    %69 = vector.broadcast %1 : vector<16x1xf32> to vector<16x8xf32>
    %70 = arith.addf %68, %69 : vector<16x8xf32>
    %c0_47 = arith.constant 0 : index
    %c5_48 = arith.constant 5 : index
    %c0_49 = arith.constant 0 : index
    %c0_50 = arith.constant 0 : index
    %71 = vector.load %arg5[%c0_47, %c5_48, %c0_49, %c0_50] : memref<1x8x16x8xf32, #tpu.memory_space<vmem>>, vector<1x1x16x8xf32>
    %72 = vector.shape_cast %71 : vector<1x1x16x8xf32> to vector<16x8xf32>
    %73 = vector.shape_cast %70 : vector<16x8xf32> to vector<1x1x16x8xf32>
    tpu.vector_store %arg5[%c0_47, %c5_48, %c0_49, %c0_50], %73 {strides = array<i32>} : memref<1x8x16x8xf32, #tpu.memory_space<vmem>>, vector<1x1x16x8xf32>,
    %c0_51 = arith.constant 0 : index
    %c6 = arith.constant 6 : index
    %c0_52 = arith.constant 0 : index
    %c0_53 = arith.constant 0 : index
    %74 = vector.load %arg2[%c0_51, %c6, %c0_52, %c0_53] : memref<1x8x48x10xf32, #tpu.memory_space<vmem>>, vector<1x1x48x10xf32>
    %75 = vector.shape_cast %74 : vector<1x1x48x10xf32> to vector<48x10xf32>
    %76 = vector.extract_strided_slice %75 {offsets = [0, 0], sizes = [48, 8], strides = [1, 1]} : vector<48x10xf32> to vector<48x8xf32>
    %77 = vector.extract_strided_slice %75 {offsets = [0, 1], sizes = [48, 8], strides = [1, 1]} : vector<48x10xf32> to vector<48x8xf32>
    %78 = vector.extract_strided_slice %75 {offsets = [0, 2], sizes = [48, 8], strides = [1, 1]} : vector<48x10xf32> to vector<48x8xf32>
    %79 = tpu.concatenate %76, %77, %78 in 0 : vector<48x8xf32>, vector<48x8xf32>, vector<48x8xf32> -> vector<144x8xf32>
    %cst_54 = arith.constant dense<0.000000e+00> : vector<16x8xf32>
    %80 = tpu.matmul %0, %79, %cst_54 {dimension_numbers = #tpu.dot_dimension_numbers<[1], [0], [0], [1], [0, 0, 1, 1], [], []>} : vector<16x144xf32>, vector<144x8xf32>, vector<16x8xf32> -> vector<16x8xf32>
    %81 = vector.broadcast %1 : vector<16x1xf32> to vector<16x8xf32>
    %82 = arith.addf %80, %81 : vector<16x8xf32>
    %c0_55 = arith.constant 0 : index
    %c6_56 = arith.constant 6 : index
    %c0_57 = arith.constant 0 : index
    %c0_58 = arith.constant 0 : index
    %83 = vector.load %arg5[%c0_55, %c6_56, %c0_57, %c0_58] : memref<1x8x16x8xf32, #tpu.memory_space<vmem>>, vector<1x1x16x8xf32>
    %84 = vector.shape_cast %83 : vector<1x1x16x8xf32> to vector<16x8xf32>
    %85 = vector.shape_cast %82 : vector<16x8xf32> to vector<1x1x16x8xf32>
    tpu.vector_store %arg5[%c0_55, %c6_56, %c0_57, %c0_58], %85 {strides = array<i32>} : memref<1x8x16x8xf32, #tpu.memory_space<vmem>>, vector<1x1x16x8xf32>,
    %c0_59 = arith.constant 0 : index
    %c7 = arith.constant 7 : index
    %c0_60 = arith.constant 0 : index
    %c0_61 = arith.constant 0 : index
    %86 = vector.load %arg2[%c0_59, %c7, %c0_60, %c0_61] : memref<1x8x48x10xf32, #tpu.memory_space<vmem>>, vector<1x1x48x10xf32>
    %87 = vector.shape_cast %86 : vector<1x1x48x10xf32> to vector<48x10xf32>
    %88 = vector.extract_strided_slice %87 {offsets = [0, 0], sizes = [48, 8], strides = [1, 1]} : vector<48x10xf32> to vector<48x8xf32>
    %89 = vector.extract_strided_slice %87 {offsets = [0, 1], sizes = [48, 8], strides = [1, 1]} : vector<48x10xf32> to vector<48x8xf32>
    %90 = vector.extract_strided_slice %87 {offsets = [0, 2], sizes = [48, 8], strides = [1, 1]} : vector<48x10xf32> to vector<48x8xf32>
    %91 = tpu.concatenate %88, %89, %90 in 0 : vector<48x8xf32>, vector<48x8xf32>, vector<48x8xf32> -> vector<144x8xf32>
    %cst_62 = arith.constant dense<0.000000e+00> : vector<16x8xf32>
    %92 = tpu.matmul %0, %91, %cst_62 {dimension_numbers = #tpu.dot_dimension_numbers<[1], [0], [0], [1], [0, 0, 1, 1], [], []>} : vector<16x144xf32>, vector<144x8xf32>, vector<16x8xf32> -> vector<16x8xf32>
    %93 = vector.broadcast %1 : vector<16x1xf32> to vector<16x8xf32>
    %94 = arith.addf %92, %93 : vector<16x8xf32>
    %c0_63 = arith.constant 0 : index
    %c7_64 = arith.constant 7 : index
    %c0_65 = arith.constant 0 : index
    %c0_66 = arith.constant 0 : index
    %95 = vector.load %arg5[%c0_63, %c7_64, %c0_65, %c0_66] : memref<1x8x16x8xf32, #tpu.memory_space<vmem>>, vector<1x1x16x8xf32>
    %96 = vector.shape_cast %95 : vector<1x1x16x8xf32> to vector<16x8xf32>
    %97 = vector.shape_cast %94 : vector<16x8xf32> to vector<1x1x16x8xf32>
    tpu.vector_store %arg5[%c0_63, %c7_64, %c0_65, %c0_66], %97 {strides = array<i32>} : memref<1x8x16x8xf32, #tpu.memory_space<vmem>>, vector<1x1x16x8xf32>,
    return
  }
  func.func @transform_0(%arg0: i32, %arg1: i32) -> (i32, i32, i32, i32) {
    %c0_i32 = arith.constant 0 : i32
    %c0_i32_0 = arith.constant 0 : i32
    %c0_i32_1 = arith.constant 0 : i32
    return %arg0, %arg1, %c0_i32, %c0_i32_0 : i32, i32, i32, i32
  }
  func.func @transform_1(%arg0: i32, %arg1: i32) -> (i32, i32) {
    %c0_i32 = arith.constant 0 : i32
    %c0_i32_0 = arith.constant 0 : i32
    %c0_i32_1 = arith.constant 0 : i32
    return %c0_i32, %c0_i32_0 : i32, i32
  }
  func.func @transform_2(%arg0: i32, %arg1: i32) -> (i32, i32) {
    %c0_i32 = arith.constant 0 : i32
    %c0_i32_0 = arith.constant 0 : i32
    %c0_i32_1 = arith.constant 0 : i32
    return %c0_i32, %c0_i32_0 : i32, i32
  }
  func.func @transform_3(%arg0: i32, %arg1: i32) -> (i32, i32, i32, i32) {
    %c0_i32 = arith.constant 0 : i32
    %c0_i32_0 = arith.constant 0 : i32
    %c0_i32_1 = arith.constant 0 : i32
    return %arg0, %arg1, %c0_i32, %c0_i32_0 : i32, i32, i32, i32
  }
}

</mosaic_0001>

<bundles_post_ra>
// kernel: downsample.2
= control target key start
LH: loop header
LB: loop body
LE: loop exit
PB: predicated region body
PF: predicated region fallthrough
CT: control target
= control target key end

     0   :  { %s2291_s12 = smov 0   ;;  %s2293_s13 = smov 0   ;;  %s2820_s0 = inlined_call_operand.vmem [shape: f32[2,16,12,18], index: 0, kind: input, shape index: {}]   ;;  %s2821_s1 = inlined_call_operand.vmem [shape: f32[4,36], index: 1, kind: input, shape index: {}]   ;;  %s2822_s2 = inlined_call_operand.vmem [shape: f32[4,1], index: 2, kind: input, shape index: {}]   ;;  %s2823_s3 = inlined_call_operand.vmem [shape: f32[2,16,4,16], index: 3, kind: output, shape index: {}]  }
   0x1   :  { %s2295_s14 = smov 0  }
   0x2 LB: > { %s25_s15 = sadd.s32 1, %s2260_s13  ;;  %p1822_p0 = scmp.ge.s32.totalorder %s2264_s14, 1  ;;  %s2264_s14 = sphi %s2295_s14, %s13_s14   ;;  %s2260_s13 = sphi %s2293_s13, %s2825_s13   ;;  %s2256_s12 = sphi %s2291_s12, %s2824_s12  }
   0x3   : > { %p27_p1 = scmp.ge.s32.totalorder %s25_s15, 2  ;;  %p159_p2 = scmp.lt.s32.totalorder %s2264_s14, 3 }
   0x5   : > { %s2827_s15 = smov (%p27_p1, %s25_s15), 0  ;;  %p160_p3 = pnand %p1822_p0, %p159_p2 }
   0x6   : > { %p193_p4 = scmp.lt.s32.totalorder (!%p160_p3), %s2256_s12, 1  ;;  %s2267_s20 = smov (!%p160_p3), 126  }
   0x7   : > { %163 = sbr.rel (%p160_p3) target bundleno = 456 (0x1c8), region = 32  ;;  %s2268_s21 = smov (!%p160_p3), 127  }
   0xc   : > { %v2266_v0 = vmov 0.0   ;;  %s2829_s12 = smov (!%p193_p4, %s2256_s12), 1  ;;  %vm219_vm0 = vcmask 1043456   ;;  %vm2269_vm1 = vmmov 0   ;;  %vm240_vm2 = vcmask 293888  }
   0xd   : > { %2004 = vmatprep.subr.mxu0 %v2266_v0  ;;  %2017 = vmatprep.subr.mxu1 %v2266_v0  ;;  %s1906_s16 = sshll.u32 %s2829_s12, 8  ;;  %s1907_s26 = sshll.u32 %s2829_s12, 6  ;;  %vm316_vm3 = vcmask 125952  }
   0xe   : > { %s2317_s19 = scalar_lea.vmem %s2820_s0, %s1906_s16  ;;  %2014 = vmatprep.mubr.msk.f32.mxu0 %vm2269_vm1, %v2266_v0  ;;  %2027 = vmatprep.mubr.msk.f32.mxu1 %vm2269_vm1, %v2266_v0  ;;  %s2777_s29 = scalar_lea.vmem %s2823_s3, %s1907_s26 }
   0xf   : > { %v2320_v1 = vld [vmem:[%s2317_s19 + $0x8] sm:$0xf]  ;;  %v2323_v2 = vld [vmem:[%s2317_s19] sm:$0xff]  ;;  %v2326_v3 = vld [vmem:[%s2317_s19 + $0x18] sm:$0xf] }
  0x10   : > { %231 = vrot.lane.b32.xlu0 %v2320_v1, %s2267_s20  ;;  %229 = vrot.lane.b32.xlu1 %v2323_v2, %s2267_s20  ;;  %v2333_v4 = vld [vmem:[%s2317_s19 + $0x10] sm:$0xff]  ;;  %v221_v5 = vrot.slane %v2320_v1, 4  ;;  %v220_v6 = vrot.slane %v2323_v2, 4  ;;  %v324_v7 = vrot.slane %v2326_v3, 4  ;;  %v2354_v11 = vld [vmem:[%s2317_s19 + $0x38] sm:$0xf] }
  0x11   : > { %v323_v8 = vrot.slane %v2333_v4, 4  ;;  %v2357_v12 = vld [vmem:[%s2317_s19 + $0x28] sm:$0xf]  ;;  %v2360_v13 = vld [vmem:[%s2317_s19 + $0x30] sm:$0xff]  ;;  %v2363_v14 = vld [vmem:[%s2317_s19 + $0x20] sm:$0xff]  ;;  %v512_v15 = vrot.slane %v2354_v11, 4 }
  0x12   : > { %v222_v10 = vsel %vm219_vm0, %v220_v6, %v221_v5  ;;  %v418_v16 = vrot.slane %v2357_v12, 4  ;;  %v511_v17 = vrot.slane %v2360_v13, 4  ;;  %v417_v18 = vrot.slane %v2363_v14, 4  ;;  %v2384_v21 = vld [vmem:[%s2317_s19 + $0x58] sm:$0xf]  ;;  %v2390_v23 = vld [vmem:[%s2317_s19 + $0x50] sm:$0xff] }
  0x13   : > { %v325_v9 = vsel %vm219_vm0, %v323_v8, %v324_v7  ;;  %v2387_v22 = vld [vmem:[%s2317_s19 + $0x48] sm:$0xf]  ;;  %v2393_v24 = vld [vmem:[%s2317_s19 + $0x40] sm:$0xff]  ;;  %v700_v25 = vrot.slane %v2384_v21, 4  ;;  %v699_v27 = vrot.slane %v2390_v23, 4  ;;  %v2420_v33 = vld [vmem:[%s2317_s19 + $0x70] sm:$0xff] }
  0x14   : > { %334 = vrot.lane.b32.xlu0 %v2326_v3, %s2267_s20  ;;  %332 = vrot.lane.b32.xlu1 %v2333_v4, %s2267_s20  ;;  %v513_v19 = vsel %vm219_vm0, %v511_v17, %v512_v15  ;;  %v419_v20 = vsel %vm219_vm0, %v417_v18, %v418_v16  ;;  %v606_v26 = vrot.slane %v2387_v22, 4  ;;  %v605_v28 = vrot.slane %v2393_v24, 4  ;;  %v2414_v31 = vld [vmem:[%s2317_s19 + $0x78] sm:$0xf]  ;;  %v2417_v32 = vld [vmem:[%s2317_s19 + $0x68] sm:$0xf] }
  0x15   : > { %v701_v29 = vsel %vm219_vm0, %v699_v27, %v700_v25  ;;  %v2423_v34 = vld [vmem:[%s2317_s19 + $0x60] sm:$0xff]  ;;  %v888_v35 = vrot.slane %v2414_v31, 4  ;;  %v794_v36 = vrot.slane %v2417_v32, 4  ;;  %v887_v37 = vrot.slane %v2420_v33, 4  ;;  %v2444_v41 = vld [vmem:[%s2317_s19 + $0x98] sm:$0xf] }
  0x16   : > { %v607_v30 = vsel %vm219_vm0, %v605_v28, %v606_v26  ;;  %v793_v38 = vrot.slane %v2423_v34, 4  ;;  %v2447_v42 = vld [vmem:[%s2317_s19 + $0x88] sm:$0xf]  ;;  %v2450_v43 = vld [vmem:[%s2317_s19 + $0x90] sm:$0xff]  ;;  %v2453_v44 = vld [vmem:[%s2317_s19 + $0x80] sm:$0xff]  ;;  %v1076_v45 = vrot.slane %v2444_v41, 4 }
  0x17   : > { %v889_v39 = vsel %vm219_vm0, %v887_v37, %v888_v35  ;;  %v982_v46 = vrot.slane %v2447_v42, 4  ;;  %v1075_v47 = vrot.slane %v2450_v43, 4  ;;  %v981_v48 = vrot.slane %v2453_v44, 4  ;;  %v2474_v51 = vld [vmem:[%s2317_s19 + $0xb8] sm:$0xf]  ;;  %v2480_v53 = vld [vmem:[%s2317_s19 + $0xb0] sm:$0xff] }
  0x18   : > { %328 = vrot.lane.b32.xlu1 %v325_v9, %s2268_s21  ;;  %225 = vrot.lane.b32.xlu0 %v222_v10, %s2268_s21  ;;  %v795_v40 = vsel %vm219_vm0, %v793_v38, %v794_v36  ;;  %v2477_v52 = vld [vmem:[%s2317_s19 + $0xa8] sm:$0xf]  ;;  %v2483_v54 = vld [vmem:[%s2317_s19 + $0xa0] sm:$0xff]  ;;  %v1264_v55 = vrot.slane %v2474_v51, 4  ;;  %v1263_v57 = vrot.slane %v2480_v53, 4 }
  0x19   : > { %v1077_v49 = vsel %vm219_vm0, %v1075_v47, %v1076_v45  ;;  %v983_v50 = vsel %vm219_vm0, %v981_v48, %v982_v46  ;;  %v1170_v56 = vrot.slane %v2477_v52, 4  ;;  %v1169_v58 = vrot.slane %v2483_v54, 4  ;;  %v2504_v61 = vld [vmem:[%s2317_s19 + $0xd8] sm:$0xf]  ;;  %v2507_v62 = vld [vmem:[%s2317_s19 + $0xc8] sm:$0xf] }
  0x1a   : > { %v1265_v59 = vsel %vm219_vm0, %v1263_v57, %v1264_v55  ;;  %v2510_v63 = vld [vmem:[%s2317_s19 + $0xd0] sm:$0xff]  ;;  %v2513_v5 = vld [vmem:[%s2317_s19 + $0xc0] sm:$0xff]  ;;  %v1358_v7 = vrot.slane %v2507_v62, 4  ;;  %v2534_v16 = vld [vmem:[%s2317_s19 + $0xf8] sm:$0xf] }
  0x1b   : > { %v1171_v60 = vsel %vm219_vm0, %v1169_v58, %v1170_v56  ;;  %v1357_v9 = vrot.slane %v2513_v5, 4 }
  0x1c   : > { %326 = vrot.lane.b32.xlu1 %v323_v8, %s2268_s21  ;;  %223 = vrot.lane.b32.xlu0 %v220_v6, %s2268_s21  ;;  %v1452_v6 = vrot.slane %v2504_v61, 4  ;;  %v1451_v8 = vrot.slane %v2510_v63, 4 }
  0x1d   : > { %v1359_v15 = vsel %vm219_vm0, %v1357_v9, %v1358_v7 }
  0x1e   : > { %v1453_v10 = vsel %vm219_vm0, %v1451_v8, %v1452_v6 }
  0x20   : > { %522 = vrot.lane.b32.xlu1 %v2354_v11, %s2267_s20  ;;  %428 = vrot.lane.b32.xlu0 %v2357_v12, %s2267_s20 }
  0x24   : > { %520 = vrot.lane.b32.xlu1 %v2360_v13, %s2267_s20  ;;  %426 = vrot.lane.b32.xlu0 %v2363_v14, %s2267_s20 }
  0x28   : > { %516 = vrot.lane.b32.xlu1 %v513_v19, %s2268_s21  ;;  %422 = vrot.lane.b32.xlu0 %v419_v20, %s2268_s21  ;;  %v2543_v19 = vld [vmem:[%s2317_s19 + $0xe0] sm:$0xff]  ;;  %v1640_v20 = vrot.slane %v2534_v16, 4 }
  0x2c   : > { %514 = vrot.lane.b32.xlu1 %v511_v17, %s2268_s21  ;;  %420 = vrot.lane.b32.xlu0 %v417_v18, %s2268_s21  ;;  %v2537_v17 = vld [vmem:[%s2317_s19 + $0xe8] sm:$0xf]  ;;  %v2540_v18 = vld [vmem:[%s2317_s19 + $0xf0] sm:$0xff] }
  0x2d   : > { %v1639_v25 = vrot.slane %v2540_v18, 4  ;;  %v1546_v26 = vrot.slane %v2537_v17, 4 }
  0x2f   : > { %v1641_v35 = vsel %vm219_vm0, %v1639_v25, %v1640_v20 }
  0x30   : > { %710 = vrot.lane.b32.xlu1 %v2384_v21, %s2267_s20  ;;  %616 = vrot.lane.b32.xlu0 %v2387_v22, %s2267_s20 }
  0x34   : > { %708 = vrot.lane.b32.xlu1 %v2390_v23, %s2267_s20  ;;  %614 = vrot.lane.b32.xlu0 %v2393_v24, %s2267_s20 }
  0x38   : > { %704 = vrot.lane.b32.xlu1 %v701_v29, %s2268_s21  ;;  %610 = vrot.lane.b32.xlu0 %v607_v30, %s2268_s21  ;;  %v1545_v29 = vrot.slane %v2543_v19, 4  ;;  %v2270_v30 = vmov 0  }
  0x39   : > { %2241 = vset.pattern.permute.xlu0 %v2270_v30 }
  0x3c   : > { %702 = vrot.lane.b32.xlu1 %v699_v27, %s2268_s21  ;;  %608 = vrot.lane.b32.xlu0 %v605_v28, %s2268_s21 }
  0x40   : > { %898 = vrot.lane.b32.xlu1 %v2414_v31, %s2267_s20  ;;  %804 = vrot.lane.b32.xlu0 %v2417_v32, %s2267_s20 }
  0x44   : > { %896 = vrot.lane.b32.xlu1 %v2420_v33, %s2267_s20  ;;  %802 = vrot.lane.b32.xlu0 %v2423_v34, %s2267_s20 }
  0x48   : > { %892 = vrot.lane.b32.xlu1 %v889_v39, %s2268_s21  ;;  %798 = vrot.lane.b32.xlu0 %v795_v40, %s2268_s21 }
  0x4c   : > { %890 = vrot.lane.b32.xlu1 %v887_v37, %s2268_s21  ;;  %796 = vrot.lane.b32.xlu0 %v793_v38, %s2268_s21  ;;  %v1547_v38 = vsel %vm219_vm0, %v1545_v29, %v1546_v26 }
  0x50   : > { %1086 = vrot.lane.b32.xlu1 %v2444_v41, %s2267_s20  ;;  %992 = vrot.lane.b32.xlu0 %v2447_v42, %s2267_s20 }
  0x54   : > { %1084 = vrot.lane.b32.xlu1 %v2450_v43, %s2267_s20  ;;  %990 = vrot.lane.b32.xlu0 %v2453_v44, %s2267_s20 }
  0x58   : > { %1080 = vrot.lane.b32.xlu1 %v1077_v49, %s2268_s21  ;;  %986 = vrot.lane.b32.xlu0 %v983_v50, %s2268_s21  ;;  %v2580_v49 = vld [vmem:[%s2821_s1] sm:$0xf] }
  0x5c   : > { %1078 = vrot.lane.b32.xlu1 %v1075_v47, %s2268_s21  ;;  %984 = vrot.lane.b32.xlu0 %v981_v48, %s2268_s21 }
  0x60   : > { %1274 = vrot.lane.b32.xlu1 %v2474_v51, %s2267_s20  ;;  %1180 = vrot.lane.b32.xlu0 %v2477_v52, %s2267_s20 }
  0x64   : > { %1272 = vrot.lane.b32.xlu1 %v2480_v53, %s2267_s20  ;;  %1178 = vrot.lane.b32.xlu0 %v2483_v54, %s2267_s20 }
  0x68   : > { %1268 = vrot.lane.b32.xlu1 %v1265_v59, %s2268_s21  ;;  %1174 = vrot.lane.b32.xlu0 %v1171_v60, %s2268_s21 }
  0x6c   : > { %1266 = vrot.lane.b32.xlu1 %v1263_v57, %s2268_s21  ;;  %1172 = vrot.lane.b32.xlu0 %v1169_v58, %s2268_s21 }
  0x70   : > { %1462 = vrot.lane.b32.xlu1 %v2504_v61, %s2267_s20  ;;  %1368 = vrot.lane.b32.xlu0 %v2507_v62, %s2267_s20 }
  0x74   : > { %1460 = vrot.lane.b32.xlu1 %v2510_v63, %s2267_s20  ;;  %1366 = vrot.lane.b32.xlu0 %v2513_v5, %s2267_s20 }
  0x78   : > { %1456 = vrot.lane.b32.xlu1 %v1453_v10, %s2268_s21  ;;  %1362 = vrot.lane.b32.xlu0 %v1359_v15, %s2268_s21 }
  0x7c   : > { %1454 = vrot.lane.b32.xlu1 %v1451_v8, %s2268_s21  ;;  %1360 = vrot.lane.b32.xlu0 %v1357_v9, %s2268_s21 }
  0x80   : > { %1650 = vrot.lane.b32.xlu1 %v2534_v16, %s2267_s20  ;;  %1556 = vrot.lane.b32.xlu0 %v2537_v17, %s2267_s20 }
  0x82   : > { %v232_v27 = vpop.permute.xlu0 %231  ;;  %v230_v28 = vpop.permute.xlu1 %229 }
  0x83   : > { %2005 = vmatpush3.msk.msra.mxu0 %vm219_vm0, %v232_v27 }
  0x84   : > { %2006 = vmatprep.subr.mxu0 %v2266_v0  ;;  %1648 = vrot.lane.b32.xlu1 %v2540_v18, %s2267_s20 }
  0x85   : > { %1554 = vrot.lane.b32.xlu0 %v2543_v19, %s2267_s20  ;;  %2007 = vmatpush3.msra.mxu0 %v230_v28 }
  0x86   : > { %v335_v36 = vpop.permute.xlu0 %334  ;;  %v333_v37 = vpop.permute.xlu1 %332  ;;  %2008 = vmatprep.subr.mxu0 %v2266_v0 }
  0x87   : > { %2018 = vmatpush3.msk.msra.mxu1 %vm219_vm0, %v335_v36 }
  0x88   : > { %2019 = vmatprep.subr.mxu1 %v2266_v0  ;;  %1644 = vrot.lane.b32.xlu1 %v1641_v35, %s2268_s21 }
  0x89   : > { %1550 = vrot.lane.b32.xlu0 %v1547_v38, %s2268_s21  ;;  %2020 = vmatpush3.msra.mxu1 %v333_v37 }
  0x8a   : > { %2021 = vmatprep.subr.mxu1 %v2266_v0  ;;  %v329_v39 = vpop.permute.xlu1 %328  ;;  %v226_v40 = vpop.permute.xlu0 %225 }
  0x8b   : > { %2009 = vmatpush3.msra.mxu0 %v226_v40  ;;  %2022 = vmatpush3.msra.mxu1 %v329_v39 }
  0x8c   : > { %1642 = vrot.lane.b32.xlu1 %v1639_v25, %s2268_s21  ;;  %2010 = vmatprep.subr.mxu0 %v2266_v0 }
  0x8d   : > { %1548 = vrot.lane.b32.xlu0 %v1545_v29, %s2268_s21  ;;  %2023 = vmatprep.subr.mxu1 %v2266_v0 }
  0x8e   : > { %v327_v45 = vpop.permute.xlu1 %326  ;;  %v224_v46 = vpop.permute.xlu0 %223 }
  0x8f   : > { %v234_v47 = vsel %vm219_vm0, %v2320_v1, %v224_v46  ;;  %v337_v48 = vsel %vm219_vm0, %v2326_v3, %v327_v45 }
  0x90   : > { %2011 = vmatpush3.msra.mxu0 %v234_v47  ;;  %2024 = vmatpush3.msra.mxu1 %v337_v48 }
  0x91   : > { %2012 = vmatprep.subr.mxu0 %v2266_v0  ;;  %2025 = vmatprep.subr.mxu1 %v2266_v0 }
  0x92   : > { %2026 = vmatpush3.msra.mxu1 %v2333_v4  ;;  %v523_v50 = vpop.permute.xlu1 %522  ;;  %2013 = vmatpush3.msra.mxu0 %v2323_v2  ;;  %v429_v1 = vpop.permute.xlu0 %428  ;;  %v214_v4 = vld [vmem:[%s2822_s2] sm:$0xf] }
  0x93   : > { %2030 = vmatprep.subr.mxu0 %v2266_v0  ;;  %2043 = vmatprep.subr.mxu1 %v2266_v0 }
  0x94   : > { %2015 = vmatmul.mubr.msk.f32.vlgmr.msra.gmra.mxu0 %vm240_vm2, %v2580_v49  ;;  %2028 = vmatmul.mubr.msk.f32.vlgmr.msra.gmra.mxu1 %vm240_vm2, %v2580_v49 }
  0x95   : > { %2031 = vmatpush3.msk.msra.mxu0 %vm219_vm0, %v429_v1  ;;  %2044 = vmatpush3.msk.msra.mxu1 %vm219_vm0, %v523_v50 }
  0x96   : > { %2045 = vmatprep.subr.mxu1 %v2266_v0  ;;  %v521_v3 = vpop.permute.xlu1 %520  ;;  %2032 = vmatprep.subr.mxu0 %v2266_v0  ;;  %v427_v2 = vpop.permute.xlu0 %426 }
  0x97   : > { %2033 = vmatpush3.msra.mxu0 %v427_v2  ;;  %2046 = vmatpush3.msra.mxu1 %v521_v3 }
  0x98   : > { %2047 = vmatprep.subr.mxu1 %v2266_v0  ;;  %2034 = vmatprep.subr.mxu0 %v2266_v0 }
  0x99   : > { %2040 = vmatprep.mubr.msk.f32.mxu0 %vm2269_vm1, %v2266_v0  ;;  %2053 = vmatprep.mubr.msk.f32.mxu1 %vm2269_vm1, %v2266_v0 }
  0x9a   : > { %v517_v55 = vpop.permute.xlu1 %516  ;;  %v423_v56 = vpop.permute.xlu0 %422  ;;  %237 = vperm.xlu0 %2241, %v214_v4  }
  0x9b   : > { %2035 = vmatpush3.msra.mxu0 %v423_v56  ;;  %2048 = vmatpush3.msra.mxu1 %v517_v55 }
  0x9c   : > { %2036 = vmatprep.subr.mxu0 %v2266_v0  ;;  %2049 = vmatprep.subr.mxu1 %v2266_v0 }
  0x9e   : > { %v515_v57 = vpop.permute.xlu1 %514  ;;  %v421_v58 = vpop.permute.xlu0 %420 }
  0x9f   : > { %v525_v59 = vsel %vm219_vm0, %v2354_v11, %v515_v57  ;;  %v431_v60 = vsel %vm219_vm0, %v2357_v12, %v421_v58 }
  0xa0   : > { %2037 = vmatpush3.msra.mxu0 %v431_v60  ;;  %2050 = vmatpush3.msra.mxu1 %v525_v59 }
  0xa1   : > { %2038 = vmatprep.subr.mxu0 %v2266_v0  ;;  %2051 = vmatprep.subr.mxu1 %v2266_v0 }
  0xa2   : > { %2052 = vmatpush3.msra.mxu1 %v2360_v13  ;;  %v711_v6 = vpop.permute.xlu1 %710  ;;  %2039 = vmatpush3.msra.mxu0 %v2363_v14  ;;  %v617_v7 = vpop.permute.xlu0 %616 }
  0xa3   : > { %2056 = vmatprep.subr.mxu0 %v2266_v0  ;;  %2069 = vmatprep.subr.mxu1 %v2266_v0 }
  0xa4   : > { %2041 = vmatmul.mubr.msk.f32.vlgmr.msra.gmra.mxu0 %vm240_vm2, %v2580_v49  ;;  %2054 = vmatmul.mubr.msk.f32.vlgmr.msra.gmra.mxu1 %vm240_vm2, %v2580_v49 }
  0xa5   : > { %2057 = vmatpush3.msk.msra.mxu0 %vm219_vm0, %v617_v7  ;;  %2070 = vmatpush3.msk.msra.mxu1 %vm219_vm0, %v711_v6 }
  0xa6   : > { %2071 = vmatprep.subr.mxu1 %v2266_v0  ;;  %v709_v11 = vpop.permute.xlu1 %708  ;;  %2058 = vmatprep.subr.mxu0 %v2266_v0  ;;  %v615_v12 = vpop.permute.xlu0 %614 }
  0xa7   : > { %2059 = vmatpush3.msra.mxu0 %v615_v12  ;;  %2072 = vmatpush3.msra.mxu1 %v709_v11 }
  0xa8   : > { %2073 = vmatprep.subr.mxu1 %v2266_v0  ;;  %2060 = vmatprep.subr.mxu0 %v2266_v0 }
  0xa9   : > { %2066 = vmatprep.mubr.msk.f32.mxu0 %vm2269_vm1, %v2266_v0  ;;  %2079 = vmatprep.mubr.msk.f32.mxu1 %vm2269_vm1, %v2266_v0 }
  0xaa   : > { %v705_v13 = vpop.permute.xlu1 %704  ;;  %v611_v14 = vpop.permute.xlu0 %610 }
  0xab   : > { %2061 = vmatpush3.msra.mxu0 %v611_v14  ;;  %2074 = vmatpush3.msra.mxu1 %v705_v13 }
  0xac   : > { %2062 = vmatprep.subr.mxu0 %v2266_v0  ;;  %2075 = vmatprep.subr.mxu1 %v2266_v0 }
  0xae   : > { %v703_v8 = vpop.permute.xlu1 %702  ;;  %v609_v9 = vpop.permute.xlu0 %608 }
  0xaf   : > { %v713_v10 = vsel %vm219_vm0, %v2384_v21, %v703_v8  ;;  %v619_v15 = vsel %vm219_vm0, %v2387_v22, %v609_v9 }
  0xb0   : > { %2063 = vmatpush3.msra.mxu0 %v619_v15  ;;  %2076 = vmatpush3.msra.mxu1 %v713_v10 }
  0xb1   : > { %2064 = vmatprep.subr.mxu0 %v2266_v0  ;;  %2077 = vmatprep.subr.mxu1 %v2266_v0 }
  0xb2   : > { %2078 = vmatpush3.msra.mxu1 %v2390_v23  ;;  %v899_v20 = vpop.permute.xlu1 %898  ;;  %2065 = vmatpush3.msra.mxu0 %v2393_v24  ;;  %v805_v25 = vpop.permute.xlu0 %804 }
  0xb3   : > { %2082 = vmatprep.subr.mxu0 %v2266_v0  ;;  %2095 = vmatprep.subr.mxu1 %v2266_v0 }
  0xb4   : > { %2067 = vmatmul.mubr.msk.f32.vlgmr.msra.gmra.mxu0 %vm240_vm2, %v2580_v49  ;;  %2080 = vmatmul.mubr.msk.f32.vlgmr.msra.gmra.mxu1 %vm240_vm2, %v2580_v49 }
  0xb5   : > { %2083 = vmatpush3.msk.msra.mxu0 %vm219_vm0, %v805_v25  ;;  %2096 = vmatpush3.msk.msra.mxu1 %vm219_vm0, %v899_v20 }
  0xb6   : > { %2097 = vmatprep.subr.mxu1 %v2266_v0  ;;  %v897_v21 = vpop.permute.xlu1 %896  ;;  %2084 = vmatprep.subr.mxu0 %v2266_v0  ;;  %v803_v22 = vpop.permute.xlu0 %802 }
  0xb7   : > { %2085 = vmatpush3.msra.mxu0 %v803_v22  ;;  %2098 = vmatpush3.msra.mxu1 %v897_v21 }
  0xb8   : > { %2099 = vmatprep.subr.mxu1 %v2266_v0  ;;  %2086 = vmatprep.subr.mxu0 %v2266_v0 }
  0xb9   : > { %2092 = vmatprep.mubr.msk.f32.mxu0 %vm2269_vm1, %v2266_v0  ;;  %2105 = vmatprep.mubr.msk.f32.mxu1 %vm2269_vm1, %v2266_v0 }
  0xba   : > { %v893_v23 = vpop.permute.xlu1 %892  ;;  %v799_v24 = vpop.permute.xlu0 %798 }
  0xbb   : > { %2087 = vmatpush3.msra.mxu0 %v799_v24  ;;  %2100 = vmatpush3.msra.mxu1 %v893_v23 }
  0xbc   : > { %2088 = vmatprep.subr.mxu0 %v2266_v0  ;;  %2101 = vmatprep.subr.mxu1 %v2266_v0 }
  0xbe   : > { %v891_v26 = vpop.permute.xlu1 %890  ;;  %v797_v27 = vpop.permute.xlu0 %796 }
  0xbf   : > { %v901_v28 = vsel %vm219_vm0, %v2414_v31, %v891_v26  ;;  %v807_v29 = vsel %vm219_vm0, %v2417_v32, %v797_v27 }
  0xc0   : > { %2089 = vmatpush3.msra.mxu0 %v807_v29  ;;  %2102 = vmatpush3.msra.mxu1 %v901_v28 }
  0xc1   : > { %2090 = vmatprep.subr.mxu0 %v2266_v0  ;;  %2103 = vmatprep.subr.mxu1 %v2266_v0 }
  0xc2   : > { %2104 = vmatpush3.msra.mxu1 %v2420_v33  ;;  %v1087_v30 = vpop.permute.xlu1 %1086  ;;  %2091 = vmatpush3.msra.mxu0 %v2423_v34  ;;  %v993_v35 = vpop.permute.xlu0 %992 }
  0xc3   : > { %2108 = vmatprep.subr.mxu0 %v2266_v0  ;;  %2121 = vmatprep.subr.mxu1 %v2266_v0 }
  0xc4   : > { %2093 = vmatmul.mubr.msk.f32.vlgmr.msra.gmra.mxu0 %vm240_vm2, %v2580_v49  ;;  %2106 = vmatmul.mubr.msk.f32.vlgmr.msra.gmra.mxu1 %vm240_vm2, %v2580_v49 }
  0xc5   : > { %2109 = vmatpush3.msk.msra.mxu0 %vm219_vm0, %v993_v35  ;;  %2122 = vmatpush3.msk.msra.mxu1 %vm219_vm0, %v1087_v30 }
  0xc6   : > { %2123 = vmatprep.subr.mxu1 %v2266_v0  ;;  %v1085_v31 = vpop.permute.xlu1 %1084  ;;  %2110 = vmatprep.subr.mxu0 %v2266_v0  ;;  %v991_v32 = vpop.permute.xlu0 %990 }
  0xc7   : > { %2111 = vmatpush3.msra.mxu0 %v991_v32  ;;  %2124 = vmatpush3.msra.mxu1 %v1085_v31 }
  0xc8   : > { %2125 = vmatprep.subr.mxu1 %v2266_v0  ;;  %2112 = vmatprep.subr.mxu0 %v2266_v0 }
  0xc9   : > { %2118 = vmatprep.mubr.msk.f32.mxu0 %vm2269_vm1, %v2266_v0  ;;  %2131 = vmatprep.mubr.msk.f32.mxu1 %vm2269_vm1, %v2266_v0 }
  0xca   : > { %v1081_v33 = vpop.permute.xlu1 %1080  ;;  %v987_v34 = vpop.permute.xlu0 %986 }
  0xcb   : > { %2113 = vmatpush3.msra.mxu0 %v987_v34  ;;  %2126 = vmatpush3.msra.mxu1 %v1081_v33 }
  0xcc   : > { %2114 = vmatprep.subr.mxu0 %v2266_v0  ;;  %2127 = vmatprep.subr.mxu1 %v2266_v0 }
  0xce   : > { %v1079_v36 = vpop.permute.xlu1 %1078  ;;  %v985_v37 = vpop.permute.xlu0 %984 }
  0xcf   : > { %v1089_v38 = vsel %vm219_vm0, %v2444_v41, %v1079_v36  ;;  %v995_v39 = vsel %vm219_vm0, %v2447_v42, %v985_v37 }
  0xd0   : > { %2115 = vmatpush3.msra.mxu0 %v995_v39  ;;  %2128 = vmatpush3.msra.mxu1 %v1089_v38 }
  0xd1   : > { %2116 = vmatprep.subr.mxu0 %v2266_v0  ;;  %2129 = vmatprep.subr.mxu1 %v2266_v0 }
  0xd2   : > { %2130 = vmatpush3.msra.mxu1 %v2450_v43  ;;  %v1275_v40 = vpop.permute.xlu1 %1274  ;;  %2117 = vmatpush3.msra.mxu0 %v2453_v44  ;;  %v1181_v45 = vpop.permute.xlu0 %1180 }
  0xd3   : > { %2134 = vmatprep.subr.mxu0 %v2266_v0  ;;  %2147 = vmatprep.subr.mxu1 %v2266_v0 }
  0xd4   : > { %2119 = vmatmul.mubr.msk.f32.vlgmr.msra.gmra.mxu0 %vm240_vm2, %v2580_v49  ;;  %2132 = vmatmul.mubr.msk.f32.vlgmr.msra.gmra.mxu1 %vm240_vm2, %v2580_v49 }
  0xd5   : > { %2135 = vmatpush3.msk.msra.mxu0 %vm219_vm0, %v1181_v45  ;;  %2148 = vmatpush3.msk.msra.mxu1 %vm219_vm0, %v1275_v40 }
  0xd6   : > { %2149 = vmatprep.subr.mxu1 %v2266_v0  ;;  %v1273_v41 = vpop.permute.xlu1 %1272  ;;  %2136 = vmatprep.subr.mxu0 %v2266_v0  ;;  %v1179_v42 = vpop.permute.xlu0 %1178 }
  0xd7   : > { %2137 = vmatpush3.msra.mxu0 %v1179_v42  ;;  %2150 = vmatpush3.msra.mxu1 %v1273_v41 }
  0xd8   : > { %2151 = vmatprep.subr.mxu1 %v2266_v0  ;;  %2138 = vmatprep.subr.mxu0 %v2266_v0 }
  0xd9   : > { %2144 = vmatprep.mubr.msk.f32.mxu0 %vm2269_vm1, %v2266_v0  ;;  %2157 = vmatprep.mubr.msk.f32.mxu1 %vm2269_vm1, %v2266_v0 }
  0xda   : > { %v1269_v43 = vpop.permute.xlu1 %1268  ;;  %v1175_v44 = vpop.permute.xlu0 %1174 }
  0xdb   : > { %2139 = vmatpush3.msra.mxu0 %v1175_v44  ;;  %2152 = vmatpush3.msra.mxu1 %v1269_v43 }
  0xdc   : > { %2140 = vmatprep.subr.mxu0 %v2266_v0  ;;  %2153 = vmatprep.subr.mxu1 %v2266_v0 }
  0xde   : > { %v1267_v46 = vpop.permute.xlu1 %1266  ;;  %v1173_v47 = vpop.permute.xlu0 %1172 }
  0xdf   : > { %v1277_v48 = vsel %vm219_vm0, %v2474_v51, %v1267_v46  ;;  %v1183_v50 = vsel %vm219_vm0, %v2477_v52, %v1173_v47 }
  0xe0   : > { %2141 = vmatpush3.msra.mxu0 %v1183_v50  ;;  %2154 = vmatpush3.msra.mxu1 %v1277_v48 }
  0xe1   : > { %2142 = vmatprep.subr.mxu0 %v2266_v0  ;;  %2155 = vmatprep.subr.mxu1 %v2266_v0 }
  0xe2   : > { %2156 = vmatpush3.msra.mxu1 %v2480_v53  ;;  %v1463_v1 = vpop.permute.xlu1 %1462  ;;  %2143 = vmatpush3.msra.mxu0 %v2483_v54  ;;  %v1369_v3 = vpop.permute.xlu0 %1368 }
  0xe3   : > { %2160 = vmatprep.subr.mxu0 %v2266_v0  ;;  %2173 = vmatprep.subr.mxu1 %v2266_v0 }
  0xe4   : > { %2145 = vmatmul.mubr.msk.f32.vlgmr.msra.gmra.mxu0 %vm240_vm2, %v2580_v49  ;;  %2158 = vmatmul.mubr.msk.f32.vlgmr.msra.gmra.mxu1 %vm240_vm2, %v2580_v49 }
  0xe5   : > { %2161 = vmatpush3.msk.msra.mxu0 %vm219_vm0, %v1369_v3  ;;  %2174 = vmatpush3.msk.msra.mxu1 %vm219_vm0, %v1463_v1 }
  0xe6   : > { %2175 = vmatprep.subr.mxu1 %v2266_v0  ;;  %v1461_v51 = vpop.permute.xlu1 %1460  ;;  %2162 = vmatprep.subr.mxu0 %v2266_v0  ;;  %v1367_v52 = vpop.permute.xlu0 %1366 }
  0xe7   : > { %2163 = vmatpush3.msra.mxu0 %v1367_v52  ;;  %2176 = vmatpush3.msra.mxu1 %v1461_v51 }
  0xe8   : > { %2177 = vmatprep.subr.mxu1 %v2266_v0  ;;  %2164 = vmatprep.subr.mxu0 %v2266_v0 }
  0xe9   : > { %2170 = vmatprep.mubr.msk.f32.mxu0 %vm2269_vm1, %v2266_v0  ;;  %2183 = vmatprep.mubr.msk.f32.mxu1 %vm2269_vm1, %v2266_v0 }
  0xea   : > { %v1457_v53 = vpop.permute.xlu1 %1456  ;;  %v1363_v54 = vpop.permute.xlu0 %1362 }
  0xeb   : > { %2165 = vmatpush3.msra.mxu0 %v1363_v54  ;;  %2178 = vmatpush3.msra.mxu1 %v1457_v53 }
  0xec   : > { %2166 = vmatprep.subr.mxu0 %v2266_v0  ;;  %2179 = vmatprep.subr.mxu1 %v2266_v0 }
  0xee   : > { %v1455_v2 = vpop.permute.xlu1 %1454  ;;  %v1361_v4 = vpop.permute.xlu0 %1360 }
  0xef   : > { %v1465_v55 = vsel %vm219_vm0, %v2504_v61, %v1455_v2  ;;  %v1371_v56 = vsel %vm219_vm0, %v2507_v62, %v1361_v4 }
  0xf0   : > { %2167 = vmatpush3.msra.mxu0 %v1371_v56  ;;  %2180 = vmatpush3.msra.mxu1 %v1465_v55 }
  0xf1   : > { %2168 = vmatprep.subr.mxu0 %v2266_v0  ;;  %2181 = vmatprep.subr.mxu1 %v2266_v0 }
  0xf2   : > { %2182 = vmatpush3.msra.mxu1 %v2510_v63  ;;  %v1651_v57 = vpop.permute.xlu1 %1650  ;;  %2169 = vmatpush3.msra.mxu0 %v2513_v5  ;;  %v1557_v58 = vpop.permute.xlu0 %1556 }
  0xf3   : > { %2186 = vmatprep.subr.mxu0 %v2266_v0  ;;  %2199 = vmatprep.subr.mxu1 %v2266_v0 }
  0xf4   : > { %2171 = vmatmul.mubr.msk.f32.vlgmr.msra.gmra.mxu0 %vm240_vm2, %v2580_v49  ;;  %2184 = vmatmul.mubr.msk.f32.vlgmr.msra.gmra.mxu1 %vm240_vm2, %v2580_v49 }
  0xf5   : > { %2187 = vmatpush3.msk.msra.mxu0 %vm219_vm0, %v1557_v58  ;;  %2200 = vmatpush3.msk.msra.mxu1 %vm219_vm0, %v1651_v57 }
  0xf6   : > { %2201 = vmatprep.subr.mxu1 %v2266_v0  ;;  %v1649_v61 = vpop.permute.xlu1 %1648  ;;  %2188 = vmatprep.subr.mxu0 %v2266_v0 }
  0xf7   : > { %v1555_v62 = vpop.permute.xlu0 %1554  ;;  %2202 = vmatpush3.msra.mxu1 %v1649_v61  ;;  %2196 = vmatprep.mubr.msk.f32.mxu0 %vm2269_vm1, %v2266_v0 }
  0xf8   : > { %2189 = vmatpush3.msra.mxu0 %v1555_v62  ;;  %2203 = vmatprep.subr.mxu1 %v2266_v0 }
  0xf9   : > { %2190 = vmatprep.subr.mxu0 %v2266_v0  ;;  %2209 = vmatprep.mubr.msk.f32.mxu1 %vm2269_vm1, %v2266_v0 }
  0xfa   : > { %v1645_v63 = vpop.permute.xlu1 %1644 }
  0xfb   : > { %v1551_v5 = vpop.permute.xlu0 %1550  ;;  %2204 = vmatpush3.msra.mxu1 %v1645_v63 }
  0xfc   : > { %2191 = vmatpush3.msra.mxu0 %v1551_v5  ;;  %2205 = vmatprep.subr.mxu1 %v2266_v0 }
  0xfd   : > { %2192 = vmatprep.subr.mxu0 %v2266_v0 }
  0xfe   : > { %v1643_v59 = vpop.permute.xlu1 %1642 }
  0xff   : > { %v1653_v60 = vsel %vm219_vm0, %v2534_v16, %v1643_v59  ;;  %v1549_v6 = vpop.permute.xlu0 %1548 }
 0x100   : > { %v1559_v7 = vsel %vm219_vm0, %v2537_v17, %v1549_v6  ;;  %2206 = vmatpush3.msra.mxu1 %v1653_v60 }
 0x101   : > { %2193 = vmatpush3.msra.mxu0 %v1559_v7  ;;  %2207 = vmatprep.subr.mxu1 %v2266_v0 }
 0x102   : > { %2194 = vmatprep.subr.mxu0 %v2266_v0  ;;  %2208 = vmatpush3.msra.mxu1 %v2540_v18 }
 0x103   : > { %2195 = vmatpush3.msra.mxu0 %v2543_v19  ;;  %2210 = vmatmul.mubr.msk.f32.vlgmr.msra.gmra.mxu1 %vm240_vm2, %v2580_v49 }
 0x104   : > { %2197 = vmatmul.mubr.msk.f32.vlgmr.msra.gmra.mxu0 %vm240_vm2, %v2580_v49 }
 0x115   : > { %v238_v16 = vpop.permute.xlu0 %237 }
 0x154   : > { %v312_v11 = vpop.f32.mrf.mxu0  ;;  %v406_v17 = vpop.f32.mrf.mxu1 }
 0x155   : > { %v313_v0 = vadd.f32 %v312_v11, %v238_v16  ;;  %v407_v18 = vadd.f32 %v406_v17, %v238_v16 }
 0x156   : > { %v2016_v19 = vpop.f32.mrf.mxu0  ;;  %v2029_v12 = vpop.f32.mrf.mxu1 }
 0x157   : > { %317 = vst.msk [vmem:[%s2777_s29] sm:$0xf] %vm316_vm3, %v313_v0  ;;  %1833 = vst.msk [vmem:[%s2777_s29 + $0x4] sm:$0xf] %vm316_vm3, %v407_v18 }
 0x164   : > { %v500_v49 = vpop.f32.mrf.mxu0  ;;  %v594_v13 = vpop.f32.mrf.mxu1 }
 0x165   : > { %v501_v14 = vadd.f32 %v500_v49, %v238_v16  ;;  %v595_v8 = vadd.f32 %v594_v13, %v238_v16 }
 0x166   : > { %v2042_v9 = vpop.f32.mrf.mxu0  ;;  %v2055_v10 = vpop.f32.mrf.mxu1 }
 0x167   : > { %1838 = vst.msk [vmem:[%s2777_s29 + $0x8] sm:$0xf] %vm316_vm3, %v501_v14  ;;  %1843 = vst.msk [vmem:[%s2777_s29 + $0xc] sm:$0xf] %vm316_vm3, %v595_v8 }
 0x174   : > { %v688_v15 = vpop.f32.mrf.mxu0  ;;  %v782_v20 = vpop.f32.mrf.mxu1 }
 0x175   : > { %v689_v25 = vadd.f32 %v688_v15, %v238_v16  ;;  %v783_v21 = vadd.f32 %v782_v20, %v238_v16 }
 0x176   : > { %v2068_v22 = vpop.f32.mrf.mxu0  ;;  %v2081_v23 = vpop.f32.mrf.mxu1 }
 0x177   : > { %1848 = vst.msk [vmem:[%s2777_s29 + $0x10] sm:$0xf] %vm316_vm3, %v689_v25  ;;  %1853 = vst.msk [vmem:[%s2777_s29 + $0x14] sm:$0xf] %vm316_vm3, %v783_v21 }
 0x184   : > { %v876_v24 = vpop.f32.mrf.mxu0  ;;  %v970_v26 = vpop.f32.mrf.mxu1 }
 0x185   : > { %v877_v27 = vadd.f32 %v876_v24, %v238_v16  ;;  %v971_v28 = vadd.f32 %v970_v26, %v238_v16 }
 0x186   : > { %v2094_v29 = vpop.f32.mrf.mxu0  ;;  %v2107_v30 = vpop.f32.mrf.mxu1 }
 0x187   : > { %1858 = vst.msk [vmem:[%s2777_s29 + $0x18] sm:$0xf] %vm316_vm3, %v877_v27  ;;  %1863 = vst.msk [vmem:[%s2777_s29 + $0x1c] sm:$0xf] %vm316_vm3, %v971_v28 }
 0x194   : > { %v1064_v35 = vpop.f32.mrf.mxu0  ;;  %v1158_v31 = vpop.f32.mrf.mxu1 }
 0x195   : > { %v1065_v32 = vadd.f32 %v1064_v35, %v238_v16  ;;  %v1159_v33 = vadd.f32 %v1158_v31, %v238_v16 }
 0x196   : > { %v2120_v34 = vpop.f32.mrf.mxu0  ;;  %v2133_v36 = vpop.f32.mrf.mxu1 }
 0x197   : > { %1868 = vst.msk [vmem:[%s2777_s29 + $0x20] sm:$0xf] %vm316_vm3, %v1065_v32  ;;  %1873 = vst.msk [vmem:[%s2777_s29 + $0x24] sm:$0xf] %vm316_vm3, %v1159_v33 }
 0x1a4   : > { %v1252_v37 = vpop.f32.mrf.mxu0  ;;  %v1346_v38 = vpop.f32.mrf.mxu1 }
 0x1a5   : > { %v1253_v39 = vadd.f32 %v1252_v37, %v238_v16  ;;  %v1347_v40 = vadd.f32 %v1346_v38, %v238_v16 }
 0x1a6   : > { %v2146_v45 = vpop.f32.mrf.mxu0  ;;  %v2159_v41 = vpop.f32.mrf.mxu1 }
 0x1a7   : > { %1878 = vst.msk [vmem:[%s2777_s29 + $0x28] sm:$0xf] %vm316_vm3, %v1253_v39  ;;  %1883 = vst.msk [vmem:[%s2777_s29 + $0x2c] sm:$0xf] %vm316_vm3, %v1347_v40 }
 0x1b4   : > { %v1440_v42 = vpop.f32.mrf.mxu0  ;;  %v1534_v43 = vpop.f32.mrf.mxu1 }
 0x1b5   : > { %v1441_v44 = vadd.f32 %v1440_v42, %v238_v16  ;;  %v1535_v46 = vadd.f32 %v1534_v43, %v238_v16 }
 0x1b6   : > { %v2172_v47 = vpop.f32.mrf.mxu0  ;;  %v2185_v48 = vpop.f32.mrf.mxu1 }
 0x1b7   : > { %1888 = vst.msk [vmem:[%s2777_s29 + $0x30] sm:$0xf] %vm316_vm3, %v1441_v44  ;;  %1893 = vst.msk [vmem:[%s2777_s29 + $0x34] sm:$0xf] %vm316_vm3, %v1535_v46 }
 0x1c3   : > { %v1722_v50 = vpop.f32.mrf.mxu1 }
 0x1c4   : > { %v1628_v1 = vpop.f32.mrf.mxu0  ;;  %v1723_v3 = vadd.f32 %v1722_v50, %v238_v16 }
 0x1c5   : > { %v1629_v51 = vadd.f32 %v1628_v1, %v238_v16  ;;  %v2211_v52 = vpop.f32.mrf.mxu1 }
 0x1c6   : > { %1903 = vst.msk [vmem:[%s2777_s29 + $0x3c] sm:$0xf] %vm316_vm3, %v1723_v3  ;;  %v2198_v53 = vpop.f32.mrf.mxu0 }
 0x1c7   : > { %1898 = vst.msk [vmem:[%s2777_s29 + $0x38] sm:$0xf] %vm316_vm3, %v1629_v51 }
 0x1c8 PF: > { %s13_s14 = sadd.s32 1, %s2264_s14   ;;  %s2824_s12 = smov %s2260_s13 }
 0x1c9   : > { %p10_p5 = scmp.ge.s32.totalorder %s13_s14, 4   ;;  %s2825_s13 = smov %s2827_s15 }
 0x1cb   :  { %12 = sbr.rel (!%p10_p5) target bundleno = 2 (0x2), region = 92 }

// kernel: downsample.3
= control target key start
LH: loop header
LB: loop body
LE: loop exit
PB: predicated region body
PF: predicated region fallthrough
CT: control target
= control target key end

     0   :  { %s1511_s12 = smov 0   ;;  %s1513_s13 = smov 0   ;;  %s2186_s0 = inlined_call_operand.vmem [shape: f32[2,8,48,10], index: 0, kind: input, shape index: {}]   ;;  %s2187_s1 = inlined_call_operand.vmem [shape: f32[16,144], index: 1, kind: input, shape index: {}]   ;;  %s2188_s2 = inlined_call_operand.vmem [shape: f32[16,1], index: 2, kind: input, shape index: {}]   ;;  %s2189_s3 = inlined_call_operand.vmem [shape: f32[2,8,16,8], index: 3, kind: output, shape index: {}]  }
   0x1   :  { %s1515_s14 = smov 0  }
   0x2 LB: > { %s25_s15 = sadd.s32 1, %s1481_s13  ;;  %p1353_p0 = scmp.ge.s32.totalorder %s1485_s14, 1  ;;  %s1485_s14 = sphi %s1515_s14, %s13_s14   ;;  %s1481_s13 = sphi %s1513_s13, %s2191_s13   ;;  %s1477_s12 = sphi %s1511_s12, %s2190_s12  }
   0x3   : > { %p27_p1 = scmp.ge.s32.totalorder %s25_s15, 2  ;;  %p159_p2 = scmp.lt.s32.totalorder %s1485_s14, 3 }
   0x5   : > { %s2193_s15 = smov (%p27_p1, %s25_s15), 0  ;;  %p160_p3 = pnand %p1353_p0, %p159_p2 }
   0x6   : > { %p194_p4 = scmp.lt.s32.totalorder (!%p160_p3), %s1477_s12, 1  ;;  %s1488_s20 = smov (!%p160_p3), 126  }
   0x7   : > { %163 = sbr.rel (%p160_p3) target bundleno = 536 (0x218), region = 32  ;;  %s1489_s21 = smov (!%p160_p3), 127  }
   0xc   : > { %v1487_v0 = vmov 0.0   ;;  %s2195_s12 = smov (!%p194_p4, %s1477_s12), 1  ;;  %v1622_v13 = vld [vmem:[%s2187_s1 + $0x8] sm:$0xff]  ;;  %vm279_vm0 = vcmask 130048   ;;  %v1490_v60 = vmov 0   ;;  %vm361_vm1 = vcmask 64512  }
   0xd   : > { %286 = vmatprep.subr.mxu0 %v1487_v0  ;;  %413 = vmatprep.subr.mxu1 %v1487_v0  ;;  %s1432_s16 = smul.u32 384, %s2195_s12  ;;  %s1431_s7 = sshll.u32 %s2195_s12, 7 }
   0xe   : > { %1357 = vmatprep.mubr.msk.f32.mxu0 %vm279_vm0, %v1622_v13  ;;  %1365 = vmatprep.mubr.msk.f32.mxu1 %vm279_vm0, %v1622_v13  ;;  %s2143_s10 = scalar_lea.vmem %s2189_s3, %s1431_s7 }
   0xf   : > { %s1537_s19 = scalar_lea.vmem %s2186_s0, %s1432_s16  ;;  %1461 = vset.pattern.permute.xlu0 %v1490_v60  ;;  %1462 = vset.pattern.permute.xlu1 %v1490_v60  ;;  %v1954_v60 = vld [vmem:[%s2187_s1 + $0x18] sm:$0xff] }
  0x10   : > { %v1540_v1 = vld [vmem:[%s1537_s19 + $0x18] sm:$0xff]  ;;  %v1543_v2 = vld [vmem:[%s1537_s19 + $0x10] sm:$0xff]  ;;  %v1550_v3 = vld [vmem:[%s1537_s19 + $0x48] sm:$0xff] }
  0x11   : > { %257 = vrot.lane.b32.xlu0 %v1540_v1, %s1488_s20  ;;  %255 = vrot.lane.b32.xlu1 %v1543_v2, %s1488_s20  ;;  %v1553_v4 = vld [vmem:[%s1537_s19 + $0x40] sm:$0xff]  ;;  %v1560_v5 = vld [vmem:[%s1537_s19 + $0x38] sm:$0xff] }
  0x12   : > { %v1563_v6 = vld [vmem:[%s1537_s19 + $0x8] sm:$0xff]  ;;  %v1570_v7 = vld [vmem:[%s1537_s19 + $0x30] sm:$0xff]  ;;  %v1573_v8 = vld [vmem:[%s1537_s19] sm:$0xff] }
  0x13   : > { %v1580_v9 = vld [vmem:[%s1537_s19 + $0x58] sm:$0xff]  ;;  %v1583_v10 = vld [vmem:[%s1537_s19 + $0x28] sm:$0xff]  ;;  %v1590_v11 = vld [vmem:[%s1537_s19 + $0x50] sm:$0xff] }
  0x14   : > { %v1593_v12 = vld [vmem:[%s1537_s19 + $0x20] sm:$0xff]  ;;  %v1629_v14 = vld [vmem:[%s1537_s19 + $0xa8] sm:$0xff]  ;;  %v1632_v15 = vld [vmem:[%s1537_s19 + $0x78] sm:$0xff] }
  0x15   : > { %401 = vrot.lane.b32.xlu0 %v1550_v3, %s1488_s20  ;;  %399 = vrot.lane.b32.xlu1 %v1553_v4, %s1488_s20  ;;  %v1643_v16 = vld [vmem:[%s1537_s19 + $0xa0] sm:$0xff]  ;;  %v1646_v17 = vld [vmem:[%s1537_s19 + $0x70] sm:$0xff] }
  0x16   : > { %v1653_v18 = vld [vmem:[%s1537_s19 + $0x98] sm:$0xff]  ;;  %v1656_v19 = vld [vmem:[%s1537_s19 + $0x68] sm:$0xff]  ;;  %v1663_v20 = vld [vmem:[%s1537_s19 + $0x90] sm:$0xff] }
  0x17   : > { %v1666_v21 = vld [vmem:[%s1537_s19 + $0x60] sm:$0xff]  ;;  %v1673_v22 = vld [vmem:[%s1537_s19 + $0xb8] sm:$0xff]  ;;  %v1676_v23 = vld [vmem:[%s1537_s19 + $0x88] sm:$0xff] }
  0x18   : > { %v1683_v24 = vld [vmem:[%s1537_s19 + $0xb0] sm:$0xff]  ;;  %v1686_v25 = vld [vmem:[%s1537_s19 + $0x80] sm:$0xff]  ;;  %v1717_v26 = vld [vmem:[%s1537_s19 + $0x108] sm:$0xff] }
  0x19   : > { %397 = vrot.lane.b32.xlu1 %v1560_v5, %s1488_s20  ;;  %253 = vrot.lane.b32.xlu0 %v1563_v6, %s1488_s20  ;;  %v1720_v27 = vld [vmem:[%s1537_s19 + $0xd8] sm:$0xff]  ;;  %v1727_v28 = vld [vmem:[%s1537_s19 + $0x100] sm:$0xff] }
  0x1a   : > { %v1730_v29 = vld [vmem:[%s1537_s19 + $0xd0] sm:$0xff]  ;;  %v1737_v30 = vld [vmem:[%s1537_s19 + $0xf8] sm:$0xff]  ;;  %v1740_v31 = vld [vmem:[%s1537_s19 + $0xc8] sm:$0xff] }
  0x1b   : > { %v1747_v32 = vld [vmem:[%s1537_s19 + $0xf0] sm:$0xff]  ;;  %v1750_v33 = vld [vmem:[%s1537_s19 + $0xc0] sm:$0xff]  ;;  %v1757_v34 = vld [vmem:[%s1537_s19 + $0x118] sm:$0xff] }
  0x1c   : > { %v1760_v35 = vld [vmem:[%s1537_s19 + $0xe8] sm:$0xff]  ;;  %v1767_v36 = vld [vmem:[%s1537_s19 + $0x110] sm:$0xff]  ;;  %v1770_v39 = vld [vmem:[%s1537_s19 + $0xe0] sm:$0xff] }
  0x1d   : > { %395 = vrot.lane.b32.xlu1 %v1570_v7, %s1488_s20  ;;  %251 = vrot.lane.b32.xlu0 %v1573_v8, %s1488_s20  ;;  %v1815_v52 = vld [vmem:[%s1537_s19 + $0x168] sm:$0xff]  ;;  %v1818_v55 = vld [vmem:[%s1537_s19 + $0x138] sm:$0xff] }
  0x1e   : > { %v1827_v56 = vld [vmem:[%s1537_s19 + $0x160] sm:$0xff]  ;;  %v1830_v59 = vld [vmem:[%s1537_s19 + $0x130] sm:$0xff]  ;;  %v1839_v61 = vld [vmem:[%s1537_s19 + $0x158] sm:$0xff] }
  0x21   : > { %387 = vrot.lane.b32.xlu1 %v1580_v9, %s1489_s21  ;;  %243 = vrot.lane.b32.xlu0 %v1583_v10, %s1489_s21 }
  0x25   : > { %385 = vrot.lane.b32.xlu1 %v1590_v11, %s1489_s21  ;;  %241 = vrot.lane.b32.xlu0 %v1593_v12, %s1489_s21 }
  0x29   : > { %383 = vrot.lane.b32.xlu1 %v1550_v3, %s1489_s21  ;;  %239 = vrot.lane.b32.xlu0 %v1540_v1, %s1489_s21 }
  0x2d   : > { %381 = vrot.lane.b32.xlu1 %v1553_v4, %s1489_s21  ;;  %237 = vrot.lane.b32.xlu0 %v1543_v2, %s1489_s21 }
  0x31   : > { %379 = vrot.lane.b32.xlu1 %v1560_v5, %s1489_s21  ;;  %235 = vrot.lane.b32.xlu0 %v1563_v6, %s1489_s21 }
  0x35   : > { %377 = vrot.lane.b32.xlu1 %v1570_v7, %s1489_s21  ;;  %233 = vrot.lane.b32.xlu0 %v1573_v8, %s1489_s21 }
  0x39   : > { %405 = vrot.lane.b32.xlu1 %v1580_v9, %s1488_s20  ;;  %261 = vrot.lane.b32.xlu0 %v1583_v10, %s1488_s20 }
  0x3d   : > { %403 = vrot.lane.b32.xlu1 %v1590_v11, %s1488_s20  ;;  %259 = vrot.lane.b32.xlu0 %v1593_v12, %s1488_s20 }
  0x41   : > { %655 = vrot.lane.b32.xlu1 %v1629_v14, %s1488_s20  ;;  %528 = vrot.lane.b32.xlu0 %v1632_v15, %s1488_s20 }
  0x45   : > { %653 = vrot.lane.b32.xlu1 %v1643_v16, %s1488_s20  ;;  %526 = vrot.lane.b32.xlu0 %v1646_v17, %s1488_s20 }
  0x49   : > { %651 = vrot.lane.b32.xlu1 %v1653_v18, %s1488_s20  ;;  %524 = vrot.lane.b32.xlu0 %v1656_v19, %s1488_s20 }
  0x4d   : > { %649 = vrot.lane.b32.xlu1 %v1663_v20, %s1488_s20  ;;  %522 = vrot.lane.b32.xlu0 %v1666_v21, %s1488_s20 }
  0x51   : > { %641 = vrot.lane.b32.xlu1 %v1673_v22, %s1489_s21  ;;  %514 = vrot.lane.b32.xlu0 %v1676_v23, %s1489_s21 }
  0x55   : > { %639 = vrot.lane.b32.xlu1 %v1683_v24, %s1489_s21  ;;  %512 = vrot.lane.b32.xlu0 %v1686_v25, %s1489_s21 }
  0x59   : > { %637 = vrot.lane.b32.xlu1 %v1629_v14, %s1489_s21  ;;  %510 = vrot.lane.b32.xlu0 %v1632_v15, %s1489_s21 }
  0x5d   : > { %635 = vrot.lane.b32.xlu1 %v1643_v16, %s1489_s21  ;;  %508 = vrot.lane.b32.xlu0 %v1646_v17, %s1489_s21 }
  0x61   : > { %633 = vrot.lane.b32.xlu1 %v1653_v18, %s1489_s21  ;;  %506 = vrot.lane.b32.xlu0 %v1656_v19, %s1489_s21 }
  0x65   : > { %631 = vrot.lane.b32.xlu1 %v1663_v20, %s1489_s21  ;;  %504 = vrot.lane.b32.xlu0 %v1666_v21, %s1489_s21 }
  0x69   : > { %659 = vrot.lane.b32.xlu1 %v1673_v22, %s1488_s20  ;;  %532 = vrot.lane.b32.xlu0 %v1676_v23, %s1488_s20 }
  0x6d   : > { %657 = vrot.lane.b32.xlu1 %v1683_v24, %s1488_s20  ;;  %530 = vrot.lane.b32.xlu0 %v1686_v25, %s1488_s20 }
  0x71   : > { %909 = vrot.lane.b32.xlu1 %v1717_v26, %s1488_s20  ;;  %782 = vrot.lane.b32.xlu0 %v1720_v27, %s1488_s20 }
  0x75   : > { %907 = vrot.lane.b32.xlu1 %v1727_v28, %s1488_s20  ;;  %780 = vrot.lane.b32.xlu0 %v1730_v29, %s1488_s20 }
  0x79   : > { %905 = vrot.lane.b32.xlu1 %v1737_v30, %s1488_s20  ;;  %778 = vrot.lane.b32.xlu0 %v1740_v31, %s1488_s20 }
  0x7d   : > { %903 = vrot.lane.b32.xlu1 %v1747_v32, %s1488_s20  ;;  %776 = vrot.lane.b32.xlu0 %v1750_v33, %s1488_s20 }
  0x81   : > { %895 = vrot.lane.b32.xlu1 %v1757_v34, %s1489_s21  ;;  %768 = vrot.lane.b32.xlu0 %v1760_v35, %s1489_s21 }
  0x83   : > { %v258_v37 = vpop.permute.xlu0 %257  ;;  %v256_v38 = vpop.permute.xlu1 %255 }
  0x84   : > { %287 = vmatpush1.msra.mxu0 %v258_v37  ;;  %v1842_v37 = vld [vmem:[%s1537_s19 + $0x128] sm:$0xff] }
  0x85   : > { %288 = vmatprep.subr.mxu0 %v1487_v0  ;;  %893 = vrot.lane.b32.xlu1 %v1767_v36, %s1489_s21 }
  0x86   : > { %766 = vrot.lane.b32.xlu0 %v1770_v39, %s1489_s21  ;;  %289 = vmatpush1.msra.mxu0 %v256_v38 }
  0x87   : > { %v402_v40 = vpop.permute.xlu0 %401  ;;  %v400_v41 = vpop.permute.xlu1 %399  ;;  %290 = vmatprep.subr.mxu0 %v1487_v0 }
  0x88   : > { %414 = vmatpush1.msra.mxu1 %v402_v40 }
  0x89   : > { %415 = vmatprep.subr.mxu1 %v1487_v0  ;;  %891 = vrot.lane.b32.xlu1 %v1717_v26, %s1489_s21 }
  0x8a   : > { %764 = vrot.lane.b32.xlu0 %v1720_v27, %s1489_s21  ;;  %416 = vmatpush1.msra.mxu1 %v400_v41  ;;  %v1853_v41 = vld [vmem:[%s1537_s19 + $0x150] sm:$0xff] }
  0x8b   : > { %417 = vmatprep.subr.mxu1 %v1487_v0  ;;  %v398_v42 = vpop.permute.xlu1 %397  ;;  %v254_v43 = vpop.permute.xlu0 %253 }
  0x8c   : > { %291 = vmatpush1.msra.mxu0 %v254_v43  ;;  %418 = vmatpush1.msra.mxu1 %v398_v42  ;;  %v1858_v42 = vld [vmem:[%s1537_s19 + $0x120] sm:$0xff]  ;;  %v1889_v43 = vld [vmem:[%s1537_s19 + $0x170] sm:$0xff] }
  0x8d   : > { %889 = vrot.lane.b32.xlu1 %v1727_v28, %s1489_s21  ;;  %419 = vmatprep.subr.mxu1 %v1487_v0 }
  0x8e   : > { %762 = vrot.lane.b32.xlu0 %v1730_v29, %s1489_s21  ;;  %292 = vmatprep.subr.mxu0 %v1487_v0 }
  0x8f   : > { %v396_v44 = vpop.permute.xlu1 %395  ;;  %v252_v45 = vpop.permute.xlu0 %251 }
  0x90   : > { %293 = vmatpush1.msra.mxu0 %v252_v45  ;;  %420 = vmatpush1.msra.mxu1 %v396_v44 }
  0x91   : > { %887 = vrot.lane.b32.xlu1 %v1737_v30, %s1489_s21  ;;  %421 = vmatprep.subr.mxu1 %v1487_v0 }
  0x92   : > { %760 = vrot.lane.b32.xlu0 %v1740_v31, %s1489_s21  ;;  %294 = vmatprep.subr.mxu0 %v1487_v0 }
  0x93   : > { %v388_v46 = vpop.permute.xlu1 %387  ;;  %v244_v47 = vpop.permute.xlu0 %243 }
  0x94   : > { %295 = vmatpush1.msra.mxu0 %v244_v47  ;;  %422 = vmatpush1.msra.mxu1 %v388_v46 }
  0x95   : > { %885 = vrot.lane.b32.xlu1 %v1747_v32, %s1489_s21  ;;  %423 = vmatprep.subr.mxu1 %v1487_v0 }
  0x96   : > { %758 = vrot.lane.b32.xlu0 %v1750_v33, %s1489_s21  ;;  %296 = vmatprep.subr.mxu0 %v1487_v0 }
  0x97   : > { %v386_v48 = vpop.permute.xlu1 %385  ;;  %v242_v49 = vpop.permute.xlu0 %241 }
  0x98   : > { %297 = vmatpush1.msra.mxu0 %v242_v49  ;;  %424 = vmatpush1.msra.mxu1 %v386_v48 }
  0x99   : > { %913 = vrot.lane.b32.xlu1 %v1757_v34, %s1488_s20  ;;  %425 = vmatprep.subr.mxu1 %v1487_v0 }
  0x9a   : > { %786 = vrot.lane.b32.xlu0 %v1760_v35, %s1488_s20  ;;  %298 = vmatprep.subr.mxu0 %v1487_v0 }
  0x9b   : > { %v384_v50 = vpop.permute.xlu1 %383  ;;  %v240_v51 = vpop.permute.xlu0 %239 }
  0x9c   : > { %299 = vmatpush1.msra.mxu0 %v240_v51  ;;  %426 = vmatpush1.msra.mxu1 %v384_v50 }
  0x9d   : > { %911 = vrot.lane.b32.xlu1 %v1767_v36, %s1488_s20  ;;  %427 = vmatprep.subr.mxu1 %v1487_v0 }
  0x9e   : > { %784 = vrot.lane.b32.xlu0 %v1770_v39, %s1488_s20  ;;  %300 = vmatprep.subr.mxu0 %v1487_v0 }
  0x9f   : > { %v382_v53 = vpop.permute.xlu1 %381  ;;  %v238_v54 = vpop.permute.xlu0 %237 }
  0xa0   : > { %301 = vmatpush1.msra.mxu0 %v238_v54  ;;  %428 = vmatpush1.msra.mxu1 %v382_v53 }
  0xa1   : > { %1163 = vrot.lane.b32.xlu1 %v1815_v52, %s1488_s20  ;;  %429 = vmatprep.subr.mxu1 %v1487_v0 }
  0xa2   : > { %1036 = vrot.lane.b32.xlu0 %v1818_v55, %s1488_s20  ;;  %302 = vmatprep.subr.mxu0 %v1487_v0 }
  0xa3   : > { %v380_v57 = vpop.permute.xlu1 %379  ;;  %v236_v58 = vpop.permute.xlu0 %235 }
  0xa4   : > { %303 = vmatpush1.msra.mxu0 %v236_v58  ;;  %430 = vmatpush1.msra.mxu1 %v380_v57 }
  0xa5   : > { %1161 = vrot.lane.b32.xlu1 %v1827_v56, %s1488_s20  ;;  %431 = vmatprep.subr.mxu1 %v1487_v0 }
  0xa6   : > { %1034 = vrot.lane.b32.xlu0 %v1830_v59, %s1488_s20  ;;  %304 = vmatprep.subr.mxu0 %v1487_v0 }
  0xa7   : > { %v378_v62 = vpop.permute.xlu1 %377  ;;  %v234_v63 = vpop.permute.xlu0 %233 }
  0xa8   : > { %305 = vmatpush1.msra.mxu0 %v234_v63  ;;  %432 = vmatpush1.msra.mxu1 %v378_v62 }
  0xa9   : > { %1159 = vrot.lane.b32.xlu1 %v1839_v61, %s1488_s20  ;;  %433 = vmatprep.subr.mxu1 %v1487_v0 }
  0xaa   : > { %1032 = vrot.lane.b32.xlu0 %v1842_v37, %s1488_s20  ;;  %306 = vmatprep.subr.mxu0 %v1487_v0 }
  0xab   : > { %307 = vmatpush1.msra.mxu0 %v1583_v10  ;;  %434 = vmatpush1.msra.mxu1 %v1580_v9  ;;  %v406_v38 = vpop.permute.xlu1 %405  ;;  %v262_v40 = vpop.permute.xlu0 %261 }
  0xac   : > { %435 = vmatprep.subr.mxu1 %v1487_v0  ;;  %308 = vmatprep.subr.mxu0 %v1487_v0 }
  0xad   : > { %309 = vmatpush1.msra.mxu0 %v1593_v12  ;;  %436 = vmatpush1.msra.mxu1 %v1590_v11  ;;  %v1871_v12 = vld [vmem:[%s1537_s19 + $0x178] sm:$0xff]  ;;  %v1876_v11 = vld [vmem:[%s1537_s19 + $0x148] sm:$0xff] }
  0xae   : > { %1157 = vrot.lane.b32.xlu1 %v1853_v41, %s1488_s20  ;;  %437 = vmatprep.subr.mxu1 %v1487_v0 }
  0xaf   : > { %1030 = vrot.lane.b32.xlu0 %v1858_v42, %s1488_s20  ;;  %310 = vmatprep.subr.mxu0 %v1487_v0  ;;  %v404_v9 = vpop.permute.xlu1 %403  ;;  %v260_v10 = vpop.permute.xlu0 %259 }
  0xb0   : > { %311 = vmatpush1.msra.mxu0 %v1540_v1  ;;  %438 = vmatpush1.msra.mxu1 %v1550_v3 }
  0xb1   : > { %439 = vmatprep.subr.mxu1 %v1487_v0  ;;  %312 = vmatprep.subr.mxu0 %v1487_v0 }
  0xb2   : > { %313 = vmatpush1.msra.mxu0 %v1543_v2  ;;  %440 = vmatpush1.msra.mxu1 %v1553_v4  ;;  %v1894_v2 = vld [vmem:[%s1537_s19 + $0x140] sm:$0xff] }
  0xb3   : > { %1149 = vrot.lane.b32.xlu1 %v1871_v12, %s1489_s21  ;;  %441 = vmatprep.subr.mxu1 %v1487_v0  ;;  %v656_v1 = vpop.permute.xlu1 %655  ;;  %v529_v3 = vpop.permute.xlu0 %528 }
  0xb4   : > { %1022 = vrot.lane.b32.xlu0 %v1876_v11, %s1489_s21  ;;  %314 = vmatprep.subr.mxu0 %v1487_v0 }
  0xb5   : > { %315 = vmatpush1.msra.mxu0 %v1563_v6  ;;  %442 = vmatpush1.msra.mxu1 %v1560_v5 }
  0xb6   : > { %443 = vmatprep.subr.mxu1 %v1487_v0  ;;  %316 = vmatprep.subr.mxu0 %v1487_v0 }
  0xb7   : > { %317 = vmatpush1.msra.mxu0 %v1573_v8  ;;  %444 = vmatpush1.msra.mxu1 %v1570_v7  ;;  %v654_v4 = vpop.permute.xlu1 %653  ;;  %v527_v44 = vpop.permute.xlu0 %526  ;;  %v1909_v7 = vld [vmem:[%s2187_s1] sm:$0xff] }
  0xb8   : > { %1147 = vrot.lane.b32.xlu1 %v1889_v43, %s1489_s21  ;;  %473 = vmatprep.subr.mxu1 %v1487_v0 }
  0xb9   : > { %1020 = vrot.lane.b32.xlu0 %v1894_v2, %s1489_s21  ;;  %346 = vmatprep.subr.mxu0 %v1487_v0 }
  0xba   : > { %347 = vmatpush2.msra.mxu0 %v262_v40  ;;  %474 = vmatpush2.msra.mxu1 %v406_v38 }
  0xbb   : > { %475 = vmatprep.subr.mxu1 %v1487_v0  ;;  %348 = vmatprep.subr.mxu0 %v1487_v0  ;;  %v652_v5 = vpop.permute.xlu1 %651  ;;  %v525_v6 = vpop.permute.xlu0 %524 }
  0xbc   : > { %349 = vmatpush2.msra.mxu0 %v260_v10  ;;  %476 = vmatpush2.msra.mxu1 %v404_v9 }
  0xbd   : > { %1145 = vrot.lane.b32.xlu1 %v1815_v52, %s1489_s21  ;;  %667 = vmatprep.subr.mxu1 %v1487_v0 }
  0xbe   : > { %1018 = vrot.lane.b32.xlu0 %v1818_v55, %s1489_s21  ;;  %540 = vmatprep.subr.mxu0 %v1487_v0 }
  0xbf   : > { %351 = vmatmul.mubr.f32.vlgmr.msra.gmra.mxu0 %v1909_v7  ;;  %478 = vmatmul.mubr.f32.vlgmr.msra.gmra.mxu1 %v1909_v7  ;;  %v650_v8 = vpop.permute.xlu1 %649  ;;  %v523_v45 = vpop.permute.xlu0 %522 }
  0xc0   : > { %541 = vmatpush1.msra.mxu0 %v529_v3  ;;  %668 = vmatpush1.msra.mxu1 %v656_v1  ;;  %v219_v3 = vld [vmem:[%s2188_s2] sm:$0xff] }
  0xc1   : > { %669 = vmatprep.subr.mxu1 %v1487_v0  ;;  %542 = vmatprep.subr.mxu0 %v1487_v0 }
  0xc2   : > { %543 = vmatpush1.msra.mxu0 %v527_v44  ;;  %670 = vmatpush1.msra.mxu1 %v654_v4  ;;  %v220_v44 = vld [vmem:[%s2188_s2 + $0x8] sm:$0xff] }
  0xc3   : > { %1143 = vrot.lane.b32.xlu1 %v1827_v56, %s1489_s21  ;;  %671 = vmatprep.subr.mxu1 %v1487_v0  ;;  %v642_v46 = vpop.permute.xlu1 %641  ;;  %v515_v47 = vpop.permute.xlu0 %514 }
  0xc4   : > { %1016 = vrot.lane.b32.xlu0 %v1830_v59, %s1489_s21  ;;  %544 = vmatprep.subr.mxu0 %v1487_v0 }
  0xc5   : > { %545 = vmatpush1.msra.mxu0 %v525_v6  ;;  %672 = vmatpush1.msra.mxu1 %v652_v5 }
  0xc6   : > { %673 = vmatprep.subr.mxu1 %v1487_v0  ;;  %546 = vmatprep.subr.mxu0 %v1487_v0 }
  0xc7   : > { %547 = vmatpush1.msra.mxu0 %v523_v45  ;;  %674 = vmatpush1.msra.mxu1 %v650_v8  ;;  %v640_v48 = vpop.permute.xlu1 %639  ;;  %v513_v49 = vpop.permute.xlu0 %512 }
  0xc8   : > { %1141 = vrot.lane.b32.xlu1 %v1839_v61, %s1489_s21  ;;  %1014 = vrot.lane.b32.xlu0 %v1842_v37, %s1489_s21 }
  0xc9   : > { %675 = vmatprep.subr.mxu1 %v1487_v0  ;;  %548 = vmatprep.subr.mxu0 %v1487_v0 }
  0xca   : > { %549 = vmatpush1.msra.mxu0 %v515_v47  ;;  %676 = vmatpush1.msra.mxu1 %v642_v46 }
  0xcb   : > { %677 = vmatprep.subr.mxu1 %v1487_v0  ;;  %550 = vmatprep.subr.mxu0 %v1487_v0  ;;  %v638_v50 = vpop.permute.xlu1 %637  ;;  %v511_v51 = vpop.permute.xlu0 %510 }
  0xcc   : > { %1139 = vrot.lane.b32.xlu1 %v1853_v41, %s1489_s21  ;;  %1012 = vrot.lane.b32.xlu0 %v1858_v42, %s1489_s21 }
  0xcd   : > { %551 = vmatpush1.msra.mxu0 %v513_v49  ;;  %678 = vmatpush1.msra.mxu1 %v640_v48 }
  0xce   : > { %679 = vmatprep.subr.mxu1 %v1487_v0  ;;  %552 = vmatprep.subr.mxu0 %v1487_v0 }
  0xcf   : > { %553 = vmatpush1.msra.mxu0 %v511_v51  ;;  %680 = vmatpush1.msra.mxu1 %v638_v50  ;;  %v636_v53 = vpop.permute.xlu1 %635  ;;  %v509_v54 = vpop.permute.xlu0 %508 }
  0xd0   : > { %681 = vmatprep.subr.mxu1 %v1487_v0  ;;  %554 = vmatprep.subr.mxu0 %v1487_v0 }
  0xd1   : > { %555 = vmatpush1.msra.mxu0 %v509_v54  ;;  %682 = vmatpush1.msra.mxu1 %v636_v53 }
  0xd2   : > { %1167 = vrot.lane.b32.xlu1 %v1871_v12, %s1488_s20  ;;  %1040 = vrot.lane.b32.xlu0 %v1876_v11, %s1488_s20 }
  0xd3   : > { %683 = vmatprep.subr.mxu1 %v1487_v0  ;;  %v634_v57 = vpop.permute.xlu1 %633  ;;  %556 = vmatprep.subr.mxu0 %v1487_v0  ;;  %v507_v58 = vpop.permute.xlu0 %506 }
  0xd4   : > { %557 = vmatpush1.msra.mxu0 %v507_v58  ;;  %684 = vmatpush1.msra.mxu1 %v634_v57 }
  0xd5   : > { %685 = vmatprep.subr.mxu1 %v1487_v0  ;;  %558 = vmatprep.subr.mxu0 %v1487_v0 }
  0xd6   : > { %1165 = vrot.lane.b32.xlu1 %v1889_v43, %s1488_s20  ;;  %1038 = vrot.lane.b32.xlu0 %v1894_v2, %s1488_s20 }
  0xd7   : > { %v632_v62 = vpop.permute.xlu1 %631  ;;  %v505_v63 = vpop.permute.xlu0 %504  ;;  %1358 = vmatprep.mubr.msk.f32.mxu0 %vm279_vm0, %v1954_v60  ;;  %1366 = vmatprep.mubr.msk.f32.mxu1 %vm279_vm0, %v1954_v60 }
  0xd8   : > { %559 = vmatpush1.msra.mxu0 %v505_v63  ;;  %686 = vmatpush1.msra.mxu1 %v632_v62 }
  0xd9   : > { %560 = vmatprep.subr.mxu0 %v1487_v0  ;;  %687 = vmatprep.subr.mxu1 %v1487_v0 }
  0xda   : > { %561 = vmatpush1.msra.mxu0 %v1676_v23  ;;  %688 = vmatpush1.msra.mxu1 %v1673_v22 }
  0xdb   : > { %689 = vmatprep.subr.mxu1 %v1487_v0  ;;  %v660_v38 = vpop.permute.xlu1 %659  ;;  %562 = vmatprep.subr.mxu0 %v1487_v0  ;;  %v533_v40 = vpop.permute.xlu0 %532 }
  0xdc   : > { %563 = vmatpush1.msra.mxu0 %v1686_v25  ;;  %690 = vmatpush1.msra.mxu1 %v1683_v24 }
  0xdd   : > { %564 = vmatprep.subr.mxu0 %v1487_v0  ;;  %691 = vmatprep.subr.mxu1 %v1487_v0 }
  0xde   : > { %565 = vmatpush1.msra.mxu0 %v1632_v15  ;;  %692 = vmatpush1.msra.mxu1 %v1629_v14 }
  0xdf   : > { %693 = vmatprep.subr.mxu1 %v1487_v0  ;;  %v658_v22 = vpop.permute.xlu1 %657  ;;  %566 = vmatprep.subr.mxu0 %v1487_v0  ;;  %v531_v23 = vpop.permute.xlu0 %530 }
  0xe0   : > { %567 = vmatpush1.msra.mxu0 %v1646_v17  ;;  %694 = vmatpush1.msra.mxu1 %v1643_v16  ;;  %v1991_v17 = vld [vmem:[%s2187_s1 + $0x10] sm:$0xff] }
  0xe1   : > { %568 = vmatprep.subr.mxu0 %v1487_v0  ;;  %695 = vmatprep.subr.mxu1 %v1487_v0 }
  0xe2   : > { %569 = vmatpush1.msra.mxu0 %v1656_v19  ;;  %696 = vmatpush1.msra.mxu1 %v1653_v18 }
  0xe3   : > { %697 = vmatprep.subr.mxu1 %v1487_v0  ;;  %v910_v14 = vpop.permute.xlu1 %909  ;;  %570 = vmatprep.subr.mxu0 %v1487_v0  ;;  %v783_v15 = vpop.permute.xlu0 %782 }
  0xe4   : > { %571 = vmatpush1.msra.mxu0 %v1666_v21  ;;  %698 = vmatpush1.msra.mxu1 %v1663_v20 }
  0xe5   : > { %600 = vmatprep.subr.mxu0 %v1487_v0  ;;  %727 = vmatprep.subr.mxu1 %v1487_v0 }
  0xe6   : > { %356 = vmatmul.mubr.f32.gmra.mxu0 %v1991_v17  ;;  %483 = vmatmul.mubr.f32.gmra.mxu1 %v1991_v17 }
  0xe7   : > { %601 = vmatpush2.msra.mxu0 %v533_v40  ;;  %728 = vmatpush2.msra.mxu1 %v660_v38  ;;  %v908_v16 = vpop.permute.xlu1 %907  ;;  %v781_v18 = vpop.permute.xlu0 %780 }
  0xe8   : > { %729 = vmatprep.subr.mxu1 %v1487_v0  ;;  %602 = vmatprep.subr.mxu0 %v1487_v0 }
  0xe9   : > { %603 = vmatpush2.msra.mxu0 %v531_v23  ;;  %730 = vmatpush2.msra.mxu1 %v658_v22 }
  0xea   : > { %1375 = vmatprep.mubr.msk.f32.mxu0 %vm279_vm0, %v1622_v13  ;;  %1385 = vmatprep.mubr.msk.f32.mxu1 %vm279_vm0, %v1622_v13 }
  0xeb   : > { %794 = vmatprep.subr.mxu0 %v1487_v0  ;;  %921 = vmatprep.subr.mxu1 %v1487_v0  ;;  %v906_v19 = vpop.permute.xlu1 %905  ;;  %v779_v20 = vpop.permute.xlu0 %778 }
  0xec   : > { %605 = vmatmul.mubr.f32.vlgmr.msra.gmra.mxu0 %v1909_v7  ;;  %732 = vmatmul.mubr.f32.vlgmr.msra.gmra.mxu1 %v1909_v7 }
  0xed   : > { %795 = vmatpush1.msra.mxu0 %v783_v15  ;;  %922 = vmatpush1.msra.mxu1 %v910_v14 }
  0xee   : > { %923 = vmatprep.subr.mxu1 %v1487_v0  ;;  %796 = vmatprep.subr.mxu0 %v1487_v0 }
  0xef   : > { %797 = vmatpush1.msra.mxu0 %v781_v18  ;;  %924 = vmatpush1.msra.mxu1 %v908_v16  ;;  %v904_v21 = vpop.permute.xlu1 %903  ;;  %v777_v24 = vpop.permute.xlu0 %776 }
  0xf0   : > { %798 = vmatprep.subr.mxu0 %v1487_v0  ;;  %925 = vmatprep.subr.mxu1 %v1487_v0 }
  0xf1   : > { %799 = vmatpush1.msra.mxu0 %v779_v20  ;;  %926 = vmatpush1.msra.mxu1 %v906_v19 }
  0xf2   : > { %927 = vmatprep.subr.mxu1 %v1487_v0  ;;  %800 = vmatprep.subr.mxu0 %v1487_v0 }
  0xf3   : > { %801 = vmatpush1.msra.mxu0 %v777_v24  ;;  %928 = vmatpush1.msra.mxu1 %v904_v21  ;;  %v896_v25 = vpop.permute.xlu1 %895  ;;  %v769_v9 = vpop.permute.xlu0 %768 }
  0xf4   : > { %929 = vmatprep.subr.mxu1 %v1487_v0  ;;  %802 = vmatprep.subr.mxu0 %v1487_v0 }
  0xf5   : > { %803 = vmatpush1.msra.mxu0 %v769_v9  ;;  %930 = vmatpush1.msra.mxu1 %v896_v25 }
  0xf6   : > { %931 = vmatprep.subr.mxu1 %v1487_v0  ;;  %804 = vmatprep.subr.mxu0 %v1487_v0 }
  0xf7   : > { %v894_v10 = vpop.permute.xlu1 %893  ;;  %1376 = vmatprep.mubr.msk.f32.mxu0 %vm279_vm0, %v1954_v60  ;;  %1386 = vmatprep.mubr.msk.f32.mxu1 %vm279_vm0, %v1954_v60 }
  0xf8   : > { %v767_v1 = vpop.permute.xlu0 %766  ;;  %932 = vmatpush1.msra.mxu1 %v894_v10  ;;  %610 = vmatmul.mubr.f32.gmra.mxu0 %v1991_v17 }
  0xf9   : > { %805 = vmatpush1.msra.mxu0 %v767_v1  ;;  %933 = vmatprep.subr.mxu1 %v1487_v0 }
  0xfa   : > { %806 = vmatprep.subr.mxu0 %v1487_v0  ;;  %737 = vmatmul.mubr.f32.gmra.mxu1 %v1991_v17 }
  0xfb   : > { %v892_v4 = vpop.permute.xlu1 %891  ;;  %1395 = vmatprep.mubr.msk.f32.mxu0 %vm279_vm0, %v1622_v13  ;;  %1405 = vmatprep.mubr.msk.f32.mxu1 %vm279_vm0, %v1622_v13 }
  0xfc   : > { %v765_v5 = vpop.permute.xlu0 %764  ;;  %934 = vmatpush1.msra.mxu1 %v892_v4  ;;  %271 = vperm.xlu0 %1461, %v219_v3  }
  0xfd   : > { %807 = vmatpush1.msra.mxu0 %v765_v5  ;;  %935 = vmatprep.subr.mxu1 %v1487_v0 }
  0xfe   : > { %808 = vmatprep.subr.mxu0 %v1487_v0  ;;  %276 = vperm.xlu1 %1462, %v220_v44  }
  0xff   : > { %v890_v6 = vpop.permute.xlu1 %889 }
 0x100   : > { %v763_v8 = vpop.permute.xlu0 %762  ;;  %936 = vmatpush1.msra.mxu1 %v890_v6 }
 0x101   : > { %809 = vmatpush1.msra.mxu0 %v763_v8  ;;  %937 = vmatprep.subr.mxu1 %v1487_v0 }
 0x102   : > { %810 = vmatprep.subr.mxu0 %v1487_v0 }
 0x103   : > { %v888_v45 = vpop.permute.xlu1 %887 }
 0x104   : > { %v761_v46 = vpop.permute.xlu0 %760  ;;  %938 = vmatpush1.msra.mxu1 %v888_v45 }
 0x105   : > { %811 = vmatpush1.msra.mxu0 %v761_v46  ;;  %939 = vmatprep.subr.mxu1 %v1487_v0 }
 0x106   : > { %812 = vmatprep.subr.mxu0 %v1487_v0 }
 0x107   : > { %v886_v47 = vpop.permute.xlu1 %885 }
 0x108   : > { %v759_v48 = vpop.permute.xlu0 %758  ;;  %940 = vmatpush1.msra.mxu1 %v886_v47 }
 0x109   : > { %813 = vmatpush1.msra.mxu0 %v759_v48  ;;  %941 = vmatprep.subr.mxu1 %v1487_v0 }
 0x10a   : > { %814 = vmatprep.subr.mxu0 %v1487_v0  ;;  %942 = vmatpush1.msra.mxu1 %v1757_v34 }
 0x10b   : > { %815 = vmatpush1.msra.mxu0 %v1760_v35  ;;  %943 = vmatprep.subr.mxu1 %v1487_v0  ;;  %v914_v49 = vpop.permute.xlu1 %913 }
 0x10c   : > { %816 = vmatprep.subr.mxu0 %v1487_v0  ;;  %v787_v50 = vpop.permute.xlu0 %786  ;;  %944 = vmatpush1.msra.mxu1 %v1767_v36 }
 0x10d   : > { %817 = vmatpush1.msra.mxu0 %v1770_v39  ;;  %945 = vmatprep.subr.mxu1 %v1487_v0 }
 0x10e   : > { %818 = vmatprep.subr.mxu0 %v1487_v0  ;;  %946 = vmatpush1.msra.mxu1 %v1717_v26 }
 0x10f   : > { %819 = vmatpush1.msra.mxu0 %v1720_v27  ;;  %947 = vmatprep.subr.mxu1 %v1487_v0  ;;  %v912_v34 = vpop.permute.xlu1 %911 }
 0x110   : > { %820 = vmatprep.subr.mxu0 %v1487_v0  ;;  %v785_v35 = vpop.permute.xlu0 %784  ;;  %948 = vmatpush1.msra.mxu1 %v1727_v28 }
 0x111   : > { %821 = vmatpush1.msra.mxu0 %v1730_v29  ;;  %949 = vmatprep.subr.mxu1 %v1487_v0 }
 0x112   : > { %822 = vmatprep.subr.mxu0 %v1487_v0  ;;  %950 = vmatpush1.msra.mxu1 %v1737_v30 }
 0x113   : > { %823 = vmatpush1.msra.mxu0 %v1740_v31  ;;  %951 = vmatprep.subr.mxu1 %v1487_v0  ;;  %v1164_v26 = vpop.permute.xlu1 %1163 }
 0x114   : > { %824 = vmatprep.subr.mxu0 %v1487_v0  ;;  %v1037_v27 = vpop.permute.xlu0 %1036  ;;  %952 = vmatpush1.msra.mxu1 %v1747_v32 }
 0x115   : > { %825 = vmatpush1.msra.mxu0 %v1750_v33  ;;  %981 = vmatprep.subr.mxu1 %v1487_v0 }
 0x116   : > { %854 = vmatprep.subr.mxu0 %v1487_v0  ;;  %982 = vmatpush2.msra.mxu1 %v914_v49 }
 0x117   : > { %855 = vmatpush2.msra.mxu0 %v787_v50  ;;  %983 = vmatprep.subr.mxu1 %v1487_v0  ;;  %v1162_v28 = vpop.permute.xlu1 %1161 }
 0x118   : > { %856 = vmatprep.subr.mxu0 %v1487_v0  ;;  %v1035_v29 = vpop.permute.xlu0 %1034  ;;  %984 = vmatpush2.msra.mxu1 %v912_v34 }
 0x119   : > { %857 = vmatpush2.msra.mxu0 %v785_v35  ;;  %1175 = vmatprep.subr.mxu1 %v1487_v0 }
 0x11a   : > { %1048 = vmatprep.subr.mxu0 %v1487_v0  ;;  %859 = vmatmul.mubr.f32.vlgmr.msra.gmra.mxu0 %v1909_v7 }
 0x11b   : > { %986 = vmatmul.mubr.f32.vlgmr.msra.gmra.mxu1 %v1909_v7  ;;  %1049 = vmatpush1.msra.mxu0 %v1037_v27  ;;  %v1160_v30 = vpop.permute.xlu1 %1159 }
 0x11c   : > { %1176 = vmatpush1.msra.mxu1 %v1164_v26  ;;  %1050 = vmatprep.subr.mxu0 %v1487_v0  ;;  %v1033_v31 = vpop.permute.xlu0 %1032 }
 0x11d   : > { %1177 = vmatprep.subr.mxu1 %v1487_v0  ;;  %1051 = vmatpush1.msra.mxu0 %v1035_v29 }
 0x11e   : > { %1178 = vmatpush1.msra.mxu1 %v1162_v28  ;;  %1052 = vmatprep.subr.mxu0 %v1487_v0 }
 0x11f   : > { %1179 = vmatprep.subr.mxu1 %v1487_v0  ;;  %1053 = vmatpush1.msra.mxu0 %v1033_v31 }
 0x120   : > { %1180 = vmatpush1.msra.mxu1 %v1160_v30  ;;  %v1158_v32 = vpop.permute.xlu1 %1157  ;;  %1054 = vmatprep.subr.mxu0 %v1487_v0 }
 0x121   : > { %1181 = vmatprep.subr.mxu1 %v1487_v0  ;;  %v1031_v33 = vpop.permute.xlu0 %1030  ;;  %1396 = vmatprep.mubr.msk.f32.mxu0 %vm279_vm0, %v1954_v60 }
 0x122   : > { %1055 = vmatpush1.msra.mxu0 %v1031_v33  ;;  %1182 = vmatpush1.msra.mxu1 %v1158_v32 }
 0x123   : > { %1183 = vmatprep.subr.mxu1 %v1487_v0  ;;  %1056 = vmatprep.subr.mxu0 %v1487_v0 }
 0x124   : > { %1406 = vmatprep.mubr.msk.f32.mxu1 %vm279_vm0, %v1954_v60  ;;  %864 = vmatmul.mubr.f32.gmra.mxu0 %v1991_v17 }
 0x125   : > { %v1150_v36 = vpop.permute.xlu1 %1149  ;;  %991 = vmatmul.mubr.f32.gmra.mxu1 %v1991_v17  ;;  %1415 = vmatprep.mubr.msk.f32.mxu0 %vm279_vm0, %v1622_v13 }
 0x126   : > { %v1023_v39 = vpop.permute.xlu0 %1022  ;;  %1184 = vmatpush1.msra.mxu1 %v1150_v36  ;;  %1425 = vmatprep.mubr.msk.f32.mxu1 %vm279_vm0, %v1622_v13 }
 0x127   : > { %1057 = vmatpush1.msra.mxu0 %v1023_v39  ;;  %1185 = vmatprep.subr.mxu1 %v1487_v0 }
 0x128   : > { %1058 = vmatprep.subr.mxu0 %v1487_v0 }
 0x12a   : > { %v1148_v51 = vpop.permute.xlu1 %1147 }
 0x12b   : > { %v1021_v53 = vpop.permute.xlu0 %1020  ;;  %1186 = vmatpush1.msra.mxu1 %v1148_v51 }
 0x12c   : > { %1059 = vmatpush1.msra.mxu0 %v1021_v53  ;;  %1187 = vmatprep.subr.mxu1 %v1487_v0 }
 0x12d   : > { %1060 = vmatprep.subr.mxu0 %v1487_v0 }
 0x12f   : > { %v1146_v54 = vpop.permute.xlu1 %1145 }
 0x130   : > { %v1019_v57 = vpop.permute.xlu0 %1018  ;;  %1188 = vmatpush1.msra.mxu1 %v1146_v54 }
 0x131   : > { %1061 = vmatpush1.msra.mxu0 %v1019_v57  ;;  %1189 = vmatprep.subr.mxu1 %v1487_v0 }
 0x132   : > { %1062 = vmatprep.subr.mxu0 %v1487_v0 }
 0x135   : > { %v1144_v13 = vpop.permute.xlu1 %1143 }
 0x136   : > { %v1017_v58 = vpop.permute.xlu0 %1016  ;;  %1190 = vmatpush1.msra.mxu1 %v1144_v13 }
 0x137   : > { %1063 = vmatpush1.msra.mxu0 %v1017_v58  ;;  %1191 = vmatprep.subr.mxu1 %v1487_v0 }
 0x138   : > { %1064 = vmatprep.subr.mxu0 %v1487_v0 }
 0x13a   : > { %v1142_v62 = vpop.permute.xlu1 %1141  ;;  %v1015_v63 = vpop.permute.xlu0 %1014 }
 0x13b   : > { %1065 = vmatpush1.msra.mxu0 %v1015_v63  ;;  %1192 = vmatpush1.msra.mxu1 %v1142_v62 }
 0x13c   : > { %1193 = vmatprep.subr.mxu1 %v1487_v0  ;;  %1066 = vmatprep.subr.mxu0 %v1487_v0 }
 0x13e   : > { %v1140_v38 = vpop.permute.xlu1 %1139  ;;  %v1013_v40 = vpop.permute.xlu0 %1012 }
 0x13f   : > { %1067 = vmatpush1.msra.mxu0 %v1013_v40  ;;  %1194 = vmatpush1.msra.mxu1 %v1140_v38 }
 0x140   : > { %1068 = vmatprep.subr.mxu0 %v1487_v0  ;;  %1195 = vmatprep.subr.mxu1 %v1487_v0 }
 0x141   : > { %1069 = vmatpush1.msra.mxu0 %v1876_v11  ;;  %1196 = vmatpush1.msra.mxu1 %v1871_v12 }
 0x142   : > { %1070 = vmatprep.subr.mxu0 %v1487_v0  ;;  %1197 = vmatprep.subr.mxu1 %v1487_v0 }
 0x143   : > { %1071 = vmatpush1.msra.mxu0 %v1894_v2  ;;  %1198 = vmatpush1.msra.mxu1 %v1889_v43 }
 0x144   : > { %1072 = vmatprep.subr.mxu0 %v1487_v0  ;;  %1199 = vmatprep.subr.mxu1 %v1487_v0  ;;  %v1168_v12 = vpop.permute.xlu1 %1167  ;;  %v1041_v11 = vpop.permute.xlu0 %1040 }
 0x145   : > { %1073 = vmatpush1.msra.mxu0 %v1818_v55  ;;  %1200 = vmatpush1.msra.mxu1 %v1815_v52 }
 0x146   : > { %1074 = vmatprep.subr.mxu0 %v1487_v0  ;;  %1201 = vmatprep.subr.mxu1 %v1487_v0 }
 0x147   : > { %1075 = vmatpush1.msra.mxu0 %v1830_v59  ;;  %1202 = vmatpush1.msra.mxu1 %v1827_v56 }
 0x148   : > { %1076 = vmatprep.subr.mxu0 %v1487_v0  ;;  %1203 = vmatprep.subr.mxu1 %v1487_v0  ;;  %v1166_v52 = vpop.permute.xlu1 %1165  ;;  %v1039_v55 = vpop.permute.xlu0 %1038 }
 0x149   : > { %1077 = vmatpush1.msra.mxu0 %v1842_v37  ;;  %1204 = vmatpush1.msra.mxu1 %v1839_v61 }
 0x14a   : > { %1205 = vmatprep.subr.mxu1 %v1487_v0  ;;  %1078 = vmatprep.subr.mxu0 %v1487_v0 }
 0x14b   : > { %1079 = vmatpush1.msra.mxu0 %v1858_v42  ;;  %1206 = vmatpush1.msra.mxu1 %v1853_v41 }
 0x14c   : > { %1108 = vmatprep.subr.mxu0 %v1487_v0  ;;  %1235 = vmatprep.subr.mxu1 %v1487_v0 }
 0x14d   : > { %1109 = vmatpush2.msra.mxu0 %v1041_v11  ;;  %1236 = vmatpush2.msra.mxu1 %v1168_v12 }
 0x14e   : > { %1237 = vmatprep.subr.mxu1 %v1487_v0  ;;  %1110 = vmatprep.subr.mxu0 %v1487_v0 }
 0x14f   : > { %1111 = vmatpush2.msra.mxu0 %v1039_v55  ;;  %1238 = vmatpush2.msra.mxu1 %v1166_v52 }
 0x150   : > { %1113 = vmatmul.mubr.f32.vlgmr.msra.gmra.mxu0 %v1909_v7  ;;  %1240 = vmatmul.mubr.f32.vlgmr.msra.gmra.mxu1 %v1909_v7 }
 0x151   : > { %1416 = vmatprep.mubr.msk.f32.mxu0 %vm279_vm0, %v1954_v60  ;;  %1426 = vmatprep.mubr.msk.f32.mxu1 %vm279_vm0, %v1954_v60 }
 0x154   : > { %1118 = vmatmul.mubr.f32.gmra.mxu0 %v1991_v17  ;;  %1245 = vmatmul.mubr.f32.gmra.mxu1 %v1991_v17 }
 0x177   : > { %v272_v56 = vpop.permute.xlu0 %271 }
 0x179   : > { %v277_v43 = vpop.permute.xlu1 %276 }
 0x17f   : > { %v352_v59 = vpop.f32.mrf.mxu0  ;;  %v479_v0 = vpop.f32.mrf.mxu1 }
 0x180   : > { %v353_v61 = vadd.f32 %v352_v59, %v272_v56  ;;  %v480_v37 = vadd.f32 %v479_v0, %v272_v56 }
 0x181   : > { %v354_v41 = vpop.f32.mrf.mxu0  ;;  %v481_v42 = vpop.f32.mrf.mxu1 }
 0x182   : > { %362 = vst.msk [vmem:[%s2143_s10] sm:$0xff] %vm361_vm1, %v353_v61  ;;  %1367 = vst.msk [vmem:[%s2143_s10 + $0x10] sm:$0xff] %vm361_vm1, %v480_v37 }
 0x1a6   : > { %v357_v2 = vpop.f32.mrf.mxu0  ;;  %v484_v7 = vpop.f32.mrf.mxu1 }
 0x1a7   : > { %v358_v60 = vadd.f32 %v357_v2, %v277_v43  ;;  %v485_v22 = vadd.f32 %v484_v7, %v277_v43 }
 0x1a8   : > { %v486_v23 = vpop.f32.mrf.mxu1  ;;  %v359_v14 = vpop.f32.mrf.mxu0 }
 0x1a9   : > { %363 = vst.msk [vmem:[%s2143_s10 + $0x8] sm:$0xff] %vm361_vm1, %v358_v60  ;;  %1368 = vst.msk [vmem:[%s2143_s10 + $0x18] sm:$0xff] %vm361_vm1, %v485_v22 }
 0x1ac   : > { %v606_v15 = vpop.f32.mrf.mxu0  ;;  %v733_v17 = vpop.f32.mrf.mxu1 }
 0x1ad   : > { %v607_v16 = vadd.f32 %v606_v15, %v272_v56  ;;  %v734_v18 = vadd.f32 %v733_v17, %v272_v56 }
 0x1ae   : > { %v608_v19 = vpop.f32.mrf.mxu0  ;;  %v735_v20 = vpop.f32.mrf.mxu1 }
 0x1af   : > { %1377 = vst.msk [vmem:[%s2143_s10 + $0x20] sm:$0xff] %vm361_vm1, %v607_v16  ;;  %1387 = vst.msk [vmem:[%s2143_s10 + $0x30] sm:$0xff] %vm361_vm1, %v734_v18 }
 0x1b8   : > { %v611_v21 = vpop.f32.mrf.mxu0 }
 0x1b9   : > { %v612_v24 = vadd.f32 %v611_v21, %v277_v43 }
 0x1ba   : > { %v738_v25 = vpop.f32.mrf.mxu1  ;;  %v613_v9 = vpop.f32.mrf.mxu0 }
 0x1bb   : > { %1378 = vst.msk [vmem:[%s2143_s10 + $0x28] sm:$0xff] %vm361_vm1, %v612_v24  ;;  %v739_v10 = vadd.f32 %v738_v25, %v277_v43 }
 0x1bc   : > { %v740_v1 = vpop.f32.mrf.mxu1 }
 0x1bd   : > { %1388 = vst.msk [vmem:[%s2143_s10 + $0x38] sm:$0xff] %vm361_vm1, %v739_v10 }
 0x1da   : > { %v860_v3 = vpop.f32.mrf.mxu0 }
 0x1db   : > { %v861_v4 = vadd.f32 %v860_v3, %v272_v56  ;;  %v987_v44 = vpop.f32.mrf.mxu1 }
 0x1dc   : > { %v988_v5 = vadd.f32 %v987_v44, %v272_v56  ;;  %v862_v6 = vpop.f32.mrf.mxu0 }
 0x1dd   : > { %1397 = vst.msk [vmem:[%s2143_s10 + $0x40] sm:$0xff] %vm361_vm1, %v861_v4  ;;  %v989_v8 = vpop.f32.mrf.mxu1 }
 0x1de   : > { %1407 = vst.msk [vmem:[%s2143_s10 + $0x50] sm:$0xff] %vm361_vm1, %v988_v5 }
 0x1e4   : > { %v865_v45 = vpop.f32.mrf.mxu0 }
 0x1e5   : > { %v866_v46 = vadd.f32 %v865_v45, %v277_v43  ;;  %v992_v47 = vpop.f32.mrf.mxu1 }
 0x1e6   : > { %v993_v48 = vadd.f32 %v992_v47, %v277_v43  ;;  %v867_v49 = vpop.f32.mrf.mxu0 }
 0x1e7   : > { %1398 = vst.msk [vmem:[%s2143_s10 + $0x48] sm:$0xff] %vm361_vm1, %v866_v46  ;;  %v994_v50 = vpop.f32.mrf.mxu1 }
 0x1e8   : > { %1408 = vst.msk [vmem:[%s2143_s10 + $0x58] sm:$0xff] %vm361_vm1, %v993_v48 }
 0x210   : > { %v1114_v34 = vpop.f32.mrf.mxu0  ;;  %v1241_v35 = vpop.f32.mrf.mxu1 }
 0x211   : > { %v1115_v26 = vadd.f32 %v1114_v34, %v272_v56  ;;  %v1242_v27 = vadd.f32 %v1241_v35, %v272_v56 }
 0x212   : > { %v1116_v28 = vpop.f32.mrf.mxu0  ;;  %v1243_v29 = vpop.f32.mrf.mxu1 }
 0x213   : > { %1417 = vst.msk [vmem:[%s2143_s10 + $0x60] sm:$0xff] %vm361_vm1, %v1115_v26  ;;  %1427 = vst.msk [vmem:[%s2143_s10 + $0x70] sm:$0xff] %vm361_vm1, %v1242_v27 }
 0x214   : > { %v1119_v30 = vpop.f32.mrf.mxu0  ;;  %v1246_v31 = vpop.f32.mrf.mxu1 }
 0x215   : > { %v1120_v32 = vadd.f32 %v1119_v30, %v277_v43  ;;  %v1247_v33 = vadd.f32 %v1246_v31, %v277_v43 }
 0x216   : > { %v1121_v36 = vpop.f32.mrf.mxu0  ;;  %v1248_v39 = vpop.f32.mrf.mxu1 }
 0x217   : > { %1418 = vst.msk [vmem:[%s2143_s10 + $0x68] sm:$0xff] %vm361_vm1, %v1120_v32  ;;  %1428 = vst.msk [vmem:[%s2143_s10 + $0x78] sm:$0xff] %vm361_vm1, %v1247_v33 }
 0x218 PF: > { %s13_s14 = sadd.s32 1, %s1485_s14   ;;  %s2190_s12 = smov %s1481_s13 }
 0x219   : > { %p10_p5 = scmp.ge.s32.totalorder %s13_s14, 4   ;;  %s2191_s13 = smov %s2193_s15 }
 0x21b   :  { %12 = sbr.rel (!%p10_p5) target bundleno = 2 (0x2), region = 76 }

</bundles_post_ra>
